<compile_context>
chip_gen: v6e
topology: v6e:2x2x1
jax: 0.10.0
libtpu: 0.0.40
codegen_flags: <defaults>
</compile_context>

<pallas_src>
import functools

import numpy as np
import jax
import jax.numpy as jnp
from jax.experimental import pallas as pl
from jax.experimental.pallas import tpu as pltpu


def _sigmoid(x):
    return 1.0 / (1.0 + jnp.exp(-x))


# ----------------------------------------------------------------------------
# Fused decoder kernel: one grid step == one caption time-step
# ----------------------------------------------------------------------------
def _decoder_kernel(
    # inputs
    enc_ref, emb_ref,
    w_enc_ref, b_enc_ref,          # encoder_att
    w_full_ref, b_full_ref,        # full_att
    w_init_ref, b_init_ref,        # [init_h | init_c]  (fused)
    w_hz_ref, b_hz_ref,            # [LSTM_hh | f_beta | decoder_att | pad]  (fused)
    w_xe_ref, w_xa_ref,            # LSTM x-projection split into (emb, awe) parts
    w_fc_ref, b_fc_ref,            # fc
    # outputs
    pred_ref, alpha_ref,
    # scratch (persist across grid steps)
    att1_s, h_s, c_s,
    *, dims):
    B, P, F, A, E, H, V = dims
    t = pl.program_id(0)

    # ---- one-time init: hoisted encoder_att projection + init_hidden_state ----
    @pl.when(t == 0)
    def _init():
        enc2d = enc_ref[...].reshape(B * P, F)
        att1 = jnp.dot(enc2d, w_enc_ref[...], preferred_element_type=jnp.float32)
        att1_s[...] = att1.reshape(B, P, A) + b_enc_ref[...]
        mean_enc = jnp.mean(enc_ref[...], axis=1)                      # (B, F)
        hc0 = jnp.dot(mean_enc, w_init_ref[...],
                      preferred_element_type=jnp.float32) + b_init_ref[...]   # (B, 2H)
        h_s[...] = hc0[:, :H]
        c_s[...] = hc0[:, H:2 * H]

    h = h_s[...]
    c = c_s[...]
    enc = enc_ref[...]                                                 # (B, P, F)

    # ---- single fused h-projection: [LSTM_hh (4H) | f_beta (F) | decoder_att (A)] ----
    hz = jnp.dot(h, w_hz_ref[...],
                 preferred_element_type=jnp.float32) + b_hz_ref[...]   # (B, >=4H+F+A)
    h_gates = hz[:, :4 * H]                                            # (B, 4H), bias folded
    gate = _sigmoid(hz[:, 4 * H:4 * H + F])                            # (B, F)
    att2 = hz[:, 4 * H + F:4 * H + F + A]                              # (B, A)

    # ---- Attention ----
    pre = jnp.maximum(att1_s[...] + att2[:, None, :], 0.0)                        # (B, P, A)
    e = jnp.sum(pre * w_full_ref[...].reshape(1, 1, A), axis=-1) + b_full_ref[...]  # (B, P)
    m = jnp.max(e, axis=-1, keepdims=True)
    ex = jnp.exp(e - m)
    alpha = ex / jnp.sum(ex, axis=-1, keepdims=True)                              # (B, P)
    awe = gate * jnp.sum(enc * alpha[:, :, None], axis=1)                         # (B, F) gated

    # ---- LSTMCell on [embedding_t ; awe] (concat realized as split matmul) ----
    emb_t = emb_ref[0]                                                             # (B, E)
    gates = (jnp.dot(emb_t, w_xe_ref[...], preferred_element_type=jnp.float32)
             + jnp.dot(awe, w_xa_ref[...], preferred_element_type=jnp.float32)
             + h_gates)                                                             # (B, 4H)
    i_g = _sigmoid(gates[:, 0:H])
    f_g = _sigmoid(gates[:, H:2 * H])
    g_g = jnp.tanh(gates[:, 2 * H:3 * H])
    o_g = _sigmoid(gates[:, 3 * H:4 * H])
    c_new = f_g * c + i_g * g_g
    h_new = o_g * jnp.tanh(c_new)
    h_s[...] = h_new
    c_s[...] = c_new

    # ---- fc head (dropout is identity in eval mode) ----
    preds = jnp.dot(h_new, w_fc_ref[...],
                    preferred_element_type=jnp.float32) + b_fc_ref[...]            # (B, V)

    pred_ref[0] = preds
    alpha_ref[0] = alpha


# ----------------------------------------------------------------------------
# Wrapper: builds the pallas_call and matches the PyTorch forward signature
# ----------------------------------------------------------------------------
def decoder_forward(params, encoder_out, encoded_captions):
    """Returns (predictions, encoded_captions, alphas) like DecoderWithAttention.forward."""
    B = encoder_out.shape[0]
    F = encoder_out.shape[-1]
    enc = encoder_out.reshape(B, -1, F).astype(jnp.float32)            # (B, P, F)
    P = enc.shape[1]
    T = encoded_captions.shape[1]
    A = params["w_enc_att"].shape[1]
    E = params["embedding"].shape[1]
    H = params["w_lstm_h"].shape[0]
    V = params["w_fc"].shape[1]

    # nn.Embedding lookup: tiny XLA gather, streamed per-step into the kernel (time-major).
    emb = jnp.take(params["embedding"], encoded_captions, axis=0)      # (B, T, E)
    emb_tbe = jnp.transpose(emb, (1, 0, 2))                            # (T, B, E)

    # Fuse the three h-projections into one lane-aligned weight slab [4H | F | A | pad].
    w_hz = jnp.concatenate([params["w_lstm_h"], params["w_f_beta"], params["w_dec_att"]], axis=1)
    b_hz = jnp.concatenate([params["b_lstm"], params["b_f_beta"], params["b_dec_att"]], axis=1)
    pad = (-w_hz.shape[1]) % 128
    if pad:
        w_hz = jnp.pad(w_hz, ((0, 0), (0, pad)))
        b_hz = jnp.pad(b_hz, ((0, 0), (0, pad)))
    HZ = w_hz.shape[1]

    # Fuse init_h / init_c into one (F, 2H) matmul (used once, at t == 0).
    w_init = jnp.concatenate([params["w_init_h"], params["w_init_c"]], axis=1)
    b_init = jnp.concatenate([params["b_init_h"], params["b_init_c"]], axis=1)

    kernel = functools.partial(_decoder_kernel, dims=(B, P, F, A, E, H, V))
    res = lambda t: (0, 0)          # weight blocks: constant index -> stay VMEM-resident

    grid_spec = pltpu.PrefetchScalarGridSpec(
        num_scalar_prefetch=0,
        grid=(T,),
        in_specs=[
            pl.BlockSpec((B, P, F), lambda t: (0, 0, 0)),   # encoder_out (resident)
            pl.BlockSpec((1, B, E), lambda t: (t, 0, 0)),   # embeddings[t]
            pl.BlockSpec((F, A), res), pl.BlockSpec((1, A), res),        # encoder_att
            pl.BlockSpec((1, A), res), pl.BlockSpec((1, 1), res),        # full_att
            pl.BlockSpec((F, 2 * H), res), pl.BlockSpec((1, 2 * H), res),  # init_h|init_c
            pl.BlockSpec((H, HZ), res), pl.BlockSpec((1, HZ), res),      # fused h-projection
            pl.BlockSpec((E, 4 * H), res), pl.BlockSpec((F, 4 * H), res),  # LSTM x-projection
            pl.BlockSpec((H, V), res), pl.BlockSpec((1, V), res),        # fc
        ],
        out_specs=[
            pl.BlockSpec((1, B, V), lambda t: (t, 0, 0)),   # predictions (time-major)
            pl.BlockSpec((1, B, P), lambda t: (t, 0, 0)),   # alphas (time-major)
        ],
        scratch_shapes=[
            pltpu.VMEM((B, P, A), jnp.float32),   # hoisted encoder_att(encoder_out)
            pltpu.VMEM((B, H), jnp.float32),      # h carried across steps
            pltpu.VMEM((B, H), jnp.float32),      # c carried across steps
        ],
    )

    preds_tbv, alphas_tbp = pl.pallas_call(
        kernel,
        out_shape=(jax.ShapeDtypeStruct((T, B, V), jnp.float32),
                   jax.ShapeDtypeStruct((T, B, P), jnp.float32)),
        grid_spec=grid_spec,
        compiler_params=pltpu.CompilerParams(dimension_semantics=("arbitrary",)),
    )(enc, emb_tbe,
      params["w_enc_att"], params["b_enc_att"],
      params["w_full_att"], params["b_full_att"],
      w_init, b_init,
      w_hz, b_hz,
      params["w_lstm_xe"], params["w_lstm_xa"],
      params["w_fc"], params["b_fc"])

    predictions = jnp.transpose(preds_tbv, (1, 0, 2))                  # (B, T, V)
    alphas = jnp.transpose(alphas_tbp, (1, 0, 2))                      # (B, T, P)
    return predictions, encoded_captions, alphas


# ----------------------------------------------------------------------------
# Deterministic synthetic parameters (PyTorch-style inits; weights stored pre-transposed)
# ----------------------------------------------------------------------------
def make_decoder_params(key, *, feature_dim, attention_dim, embed_dim, hidden_size, vocab_size):
    F, A, E, H, V = feature_dim, attention_dim, embed_dim, hidden_size, vocab_size
    ks = jax.random.split(key, 14)

    def uni(k, shape, bound):
        return jax.random.uniform(k, shape, jnp.float32, -bound, bound)

    def linear(k, fan_in, fan_out):
        k1, k2 = jax.random.split(k)
        b = 1.0 / np.sqrt(fan_in)
        return uni(k1, (fan_in, fan_out), b), uni(k2, (1, fan_out), b)

    p = {}
    p["embedding"] = uni(ks[0], (V, E), 0.1)                       # init_weights(): U(-0.1, 0.1)
    p["w_enc_att"], p["b_enc_att"] = linear(ks[1], F, A)
    p["w_dec_att"], p["b_dec_att"] = linear(ks[2], H, A)
    wf, bf = linear(ks[3], A, 1)
    p["w_full_att"], p["b_full_att"] = jnp.transpose(wf), bf       # (1, A), (1, 1)
    p["w_init_h"], p["b_init_h"] = linear(ks[4], F, H)
    p["w_init_c"], p["b_init_c"] = linear(ks[5], F, H)
    p["w_f_beta"], p["b_f_beta"] = linear(ks[6], H, F)
    # LSTMCell(E+F -> H): PyTorch default init U(-1/sqrt(H), 1/sqrt(H)); gate order i,f,g,o.
    bl = 1.0 / np.sqrt(H)
    p["w_lstm_xe"] = uni(ks[7], (E, 4 * H), bl)
    p["w_lstm_xa"] = uni(ks[8], (F, 4 * H), bl)
    p["w_lstm_h"] = uni(ks[9], (H, 4 * H), bl)
    p["b_lstm"] = uni(ks[10], (1, 4 * H), bl) + uni(ks[11], (1, 4 * H), bl)   # b_ih + b_hh folded
    p["w_fc"] = uni(ks[12], (H, V), 0.1)                           # init_weights(): U(-0.1, 0.1)
    p["b_fc"] = jnp.zeros((1, V), jnp.float32)                     # init_weights(): fill_(0)
    return p


# ----------------------------------------------------------------------------
# Pure-JAX reference (same math, no Pallas) for a sanity check
# ----------------------------------------------------------------------------
def decoder_forward_ref(params, encoder_out, captions):
    B = encoder_out.shape[0]
    F = encoder_out.shape[-1]
    enc = encoder_out.reshape(B, -1, F).astype(jnp.float32)
    T = captions.shape[1]
    H = params["w_lstm_h"].shape[0]
    A = params["w_enc_att"].shape[1]

    emb = jnp.take(params["embedding"], captions, axis=0)
    mean_enc = jnp.mean(enc, axis=1)
    h = mean_enc @ params["w_init_h"] + params["b_init_h"]
    c = mean_enc @ params["w_init_c"] + params["b_init_c"]
    att1 = jnp.einsum("bpf,fa->bpa", enc, params["w_enc_att"]) + params["b_enc_att"]

    preds_list, alphas_list = [], []
    for t in range(T):
        att2 = h @ params["w_dec_att"] + params["b_dec_att"]
        pre = jnp.maximum(att1 + att2[:, None, :], 0.0)
        e = jnp.sum(pre * params["w_full_att"].reshape(1, 1, A), axis=-1) + params["b_full_att"]
        m = jnp.max(e, axis=-1, keepdims=True)
        ex = jnp.exp(e - m)
        alpha = ex / jnp.sum(ex, axis=-1, keepdims=True)
        awe = jnp.sum(enc * alpha[:, :, None], axis=1)
        gate = _sigmoid(h @ params["w_f_beta"] + params["b_f_beta"])
        awe = gate * awe
        gates = (emb[:, t, :] @ params["w_lstm_xe"] + awe @ params["w_lstm_xa"]
                 + h @ params["w_lstm_h"] + params["b_lstm"])
        i_g = _sigmoid(gates[:, 0:H]); f_g = _sigmoid(gates[:, H:2 * H])
        g_g = jnp.tanh(gates[:, 2 * H:3 * H]); o_g = _sigmoid(gates[:, 3 * H:])
        c = f_g * c + i_g * g_g
        h = o_g * jnp.tanh(c)
        preds_list.append(h @ params["w_fc"] + params["b_fc"])
        alphas_list.append(alpha)
    return jnp.stack(preds_list, 1), captions, jnp.stack(alphas_list, 1)


# ----------------------------------------------------------------------------
if __name__ == "__main__":
    key = jax.random.PRNGKey(0)
    kp, ke, kc = jax.random.split(key, 3)

    # Small shapes consistent with the module (feature_dim default 2048 shrunk for the demo).
    B, ENC_SIZE, T = 2, 4, 8
    FEATURE_DIM, ATTENTION_DIM, EMBED_DIM, HIDDEN_SIZE, VOCAB_SIZE = 128, 64, 32, 128, 128
    NUM_PIXELS = ENC_SIZE * ENC_SIZE

    params = make_decoder_params(
        kp, feature_dim=FEATURE_DIM, attention_dim=ATTENTION_DIM,
        embed_dim=EMBED_DIM, hidden_size=HIDDEN_SIZE, vocab_size=VOCAB_SIZE)

    encoder_out = jax.random.normal(ke, (B, ENC_SIZE, ENC_SIZE, FEATURE_DIM), jnp.float32)
    encoded_captions = jax.random.randint(kc, (B, T), 0, VOCAB_SIZE, dtype=jnp.int32)

    preds, caps_out, alphas = jax.block_until_ready(
        jax.jit(decoder_forward)(params, encoder_out, encoded_captions))

    assert preds.shape == (B, T, VOCAB_SIZE), preds.shape
    assert alphas.shape == (B, T, NUM_PIXELS), alphas.shape
    assert caps_out.shape == (B, T)
    assert bool(jnp.all(jnp.isfinite(preds))) and bool(jnp.all(jnp.isfinite(alphas)))
    np.testing.assert_allclose(np.asarray(jnp.sum(alphas, axis=-1)), 1.0, atol=1e-3)

    # Cross-check against the pure-JAX reference (loose tol: MXU default bf16 operand precision).
    ref_preds, _, ref_alphas = jax.block_until_ready(
        jax.jit(decoder_forward_ref)(params, encoder_out, encoded_captions))
    np.testing.assert_allclose(np.asarray(preds), np.asarray(ref_preds), rtol=5e-2, atol=5e-2)
    np.testing.assert_allclose(np.asarray(alphas), np.asarray(ref_alphas), rtol=5e-2, atol=5e-2)

    print("KERNEL_OK")
</pallas_src>

<mosaic_0001>
module attributes {stable_mosaic.version = 11 : i64} {
  func.func @_decoder_kernel(%arg0: i32, %arg1: memref<2x16x128xf32, #tpu.memory_space<vmem>>, %arg2: memref<1x2x32xf32, #tpu.memory_space<vmem>>, %arg3: memref<128x64xf32, #tpu.memory_space<vmem>>, %arg4: memref<1x64xf32, #tpu.memory_space<vmem>>, %arg5: memref<1x64xf32, #tpu.memory_space<vmem>>, %arg6: memref<1x1xf32, #tpu.memory_space<vmem>>, %arg7: memref<128x256xf32, #tpu.memory_space<vmem>>, %arg8: memref<1x256xf32, #tpu.memory_space<vmem>>, %arg9: memref<128x768xf32, #tpu.memory_space<vmem>>, %arg10: memref<1x768xf32, #tpu.memory_space<vmem>>, %arg11: memref<32x512xf32, #tpu.memory_space<vmem>>, %arg12: memref<128x512xf32, #tpu.memory_space<vmem>>, %arg13: memref<128x128xf32, #tpu.memory_space<vmem>>, %arg14: memref<1x128xf32, #tpu.memory_space<vmem>>, %arg15: memref<1x2x128xf32, #tpu.memory_space<vmem>>, %arg16: memref<1x2x16xf32, #tpu.memory_space<vmem>>, %arg17: memref<2x16x64xf32, #tpu.memory_space<vmem>>, %arg18: memref<2x128xf32, #tpu.memory_space<vmem>>, %arg19: memref<2x128xf32, #tpu.memory_space<vmem>>) attributes {dimension_semantics = [#tpu.dimension_semantics<arbitrary>], iteration_bounds = array<i64: 8>, scalar_prefetch = 0 : i64, scratch_operands = 3 : i64, tpu.core_type = #tpu.core_type<tc>, window_params = [{pipeline_mode = #tpu.pipeline_mode<synchronous>, transform_indices = @transform_0, window_bounds = array<i64: 2, 16, 128>}, {transform_indices = @transform_1, window_bounds = array<i64: 1, 2, 32>}, {pipeline_mode = #tpu.pipeline_mode<synchronous>, transform_indices = @transform_2, window_bounds = array<i64: 128, 64>}, {pipeline_mode = #tpu.pipeline_mode<synchronous>, transform_indices = @transform_3, window_bounds = array<i64: 1, 64>}, {pipeline_mode = #tpu.pipeline_mode<synchronous>, transform_indices = @transform_4, window_bounds = array<i64: 1, 64>}, {pipeline_mode = #tpu.pipeline_mode<synchronous>, transform_indices = @transform_5, window_bounds = array<i64: 1, 1>}, {pipeline_mode = #tpu.pipeline_mode<synchronous>, transform_indices = @transform_6, window_bounds = array<i64: 128, 256>}, {pipeline_mode = #tpu.pipeline_mode<synchronous>, transform_indices = @transform_7, window_bounds = array<i64: 1, 256>}, {pipeline_mode = #tpu.pipeline_mode<synchronous>, transform_indices = @transform_8, window_bounds = array<i64: 128, 768>}, {pipeline_mode = #tpu.pipeline_mode<synchronous>, transform_indices = @transform_9, window_bounds = array<i64: 1, 768>}, {pipeline_mode = #tpu.pipeline_mode<synchronous>, transform_indices = @transform_10, window_bounds = array<i64: 32, 512>}, {pipeline_mode = #tpu.pipeline_mode<synchronous>, transform_indices = @transform_11, window_bounds = array<i64: 128, 512>}, {pipeline_mode = #tpu.pipeline_mode<synchronous>, transform_indices = @transform_12, window_bounds = array<i64: 128, 128>}, {pipeline_mode = #tpu.pipeline_mode<synchronous>, transform_indices = @transform_13, window_bounds = array<i64: 1, 128>}, {transform_indices = @transform_14, window_bounds = array<i64: 1, 2, 128>}, {transform_indices = @transform_15, window_bounds = array<i64: 1, 2, 16>}]} {
    %c0_i32 = arith.constant 0 : i32
    %0 = arith.cmpi eq, %arg0, %c0_i32 : i32
    %1 = arith.extui %0 : i1 to i32
    %c0_i32_0 = arith.constant 0 : i32
    %2 = arith.cmpi ne, %1, %c0_i32_0 : i32
    scf.if %2 {
      %c0_59 = arith.constant 0 : index
      %c0_60 = arith.constant 0 : index
      %c0_61 = arith.constant 0 : index
      %101 = vector.load %arg1[%c0_59, %c0_60, %c0_61] : memref<2x16x128xf32, #tpu.memory_space<vmem>>, vector<2x16x128xf32>
      %102 = vector.shape_cast %101 : vector<2x16x128xf32> to vector<32x128xf32>
      %c0_62 = arith.constant 0 : index
      %c0_63 = arith.constant 0 : index
      %103 = vector.load %arg3[%c0_62, %c0_63] : memref<128x64xf32, #tpu.memory_space<vmem>>, vector<128x64xf32>
      %cst_64 = arith.constant dense<0.000000e+00> : vector<32x64xf32>
      %104 = tpu.matmul %102, %103, %cst_64 {dimension_numbers = #tpu.dot_dimension_numbers<[1], [0], [0], [1], [0, 0, 1, 1], [], []>} : vector<32x128xf32>, vector<128x64xf32>, vector<32x64xf32> -> vector<32x64xf32>
      %105 = vector.shape_cast %104 : vector<32x64xf32> to vector<2x16x64xf32>
      %c0_65 = arith.constant 0 : index
      %c0_66 = arith.constant 0 : index
      %106 = vector.load %arg4[%c0_65, %c0_66] : memref<1x64xf32, #tpu.memory_space<vmem>>, vector<1x64xf32>
      %107 = vector.shape_cast %106 : vector<1x64xf32> to vector<1x1x64xf32>
      %108 = vector.broadcast %107 : vector<1x1x64xf32> to vector<2x16x64xf32>
      %109 = arith.addf %105, %108 : vector<2x16x64xf32>
      %c0_67 = arith.constant 0 : index
      %c0_68 = arith.constant 0 : index
      %c0_69 = arith.constant 0 : index
      %110 = vector.load %arg17[%c0_67, %c0_68, %c0_69] : memref<2x16x64xf32, #tpu.memory_space<vmem>>, vector<2x16x64xf32>
      tpu.vector_store %arg17[%c0_67, %c0_68, %c0_69], %109 {strides = array<i32>} : memref<2x16x64xf32, #tpu.memory_space<vmem>>, vector<2x16x64xf32>,
      %c0_70 = arith.constant 0 : index
      %c0_71 = arith.constant 0 : index
      %c0_72 = arith.constant 0 : index
      %111 = vector.load %arg1[%c0_70, %c0_71, %c0_72] : memref<2x16x128xf32, #tpu.memory_space<vmem>>, vector<2x16x128xf32>
      %cst_73 = arith.constant dense<0.000000e+00> : vector<2x128xf32>
      %112 = vector.multi_reduction <add>, %111, %cst_73 [1] : vector<2x16x128xf32> to vector<2x128xf32>
      %cst_74 = arith.constant 1.600000e+01 : f32
      %113 = vector.broadcast %cst_74 : f32 to vector<2x128xf32>
      %114 = arith.divf %112, %113 : vector<2x128xf32>
      %c0_75 = arith.constant 0 : index
      %c0_76 = arith.constant 0 : index
      %115 = vector.load %arg7[%c0_75, %c0_76] : memref<128x256xf32, #tpu.memory_space<vmem>>, vector<128x256xf32>
      %cst_77 = arith.constant dense<0.000000e+00> : vector<2x256xf32>
      %116 = tpu.matmul %114, %115, %cst_77 {dimension_numbers = #tpu.dot_dimension_numbers<[1], [0], [0], [1], [0, 0, 1, 1], [], []>} : vector<2x128xf32>, vector<128x256xf32>, vector<2x256xf32> -> vector<2x256xf32>
      %c0_78 = arith.constant 0 : index
      %c0_79 = arith.constant 0 : index
      %117 = vector.load %arg8[%c0_78, %c0_79] : memref<1x256xf32, #tpu.memory_space<vmem>>, vector<1x256xf32>
      %118 = vector.broadcast %117 : vector<1x256xf32> to vector<2x256xf32>
      %119 = arith.addf %116, %118 : vector<2x256xf32>
      %120 = vector.extract_strided_slice %119 {offsets = [0, 0], sizes = [2, 128], strides = [1, 1]} : vector<2x256xf32> to vector<2x128xf32>
      %c0_80 = arith.constant 0 : index
      %c0_81 = arith.constant 0 : index
      %121 = vector.load %arg18[%c0_80, %c0_81] : memref<2x128xf32, #tpu.memory_space<vmem>>, vector<2x128xf32>
      tpu.vector_store %arg18[%c0_80, %c0_81], %120 {strides = array<i32>} : memref<2x128xf32, #tpu.memory_space<vmem>>, vector<2x128xf32>,
      %122 = vector.extract_strided_slice %119 {offsets = [0, 128], sizes = [2, 128], strides = [1, 1]} : vector<2x256xf32> to vector<2x128xf32>
      %c0_82 = arith.constant 0 : index
      %c0_83 = arith.constant 0 : index
      %123 = vector.load %arg19[%c0_82, %c0_83] : memref<2x128xf32, #tpu.memory_space<vmem>>, vector<2x128xf32>
      tpu.vector_store %arg19[%c0_82, %c0_83], %122 {strides = array<i32>} : memref<2x128xf32, #tpu.memory_space<vmem>>, vector<2x128xf32>,
    } else {
    }
    %c0 = arith.constant 0 : index
    %c0_1 = arith.constant 0 : index
    %3 = vector.load %arg18[%c0, %c0_1] : memref<2x128xf32, #tpu.memory_space<vmem>>, vector<2x128xf32>
    %c0_2 = arith.constant 0 : index
    %c0_3 = arith.constant 0 : index
    %4 = vector.load %arg19[%c0_2, %c0_3] : memref<2x128xf32, #tpu.memory_space<vmem>>, vector<2x128xf32>
    %c0_4 = arith.constant 0 : index
    %c0_5 = arith.constant 0 : index
    %c0_6 = arith.constant 0 : index
    %5 = vector.load %arg1[%c0_4, %c0_5, %c0_6] : memref<2x16x128xf32, #tpu.memory_space<vmem>>, vector<2x16x128xf32>
    %c0_7 = arith.constant 0 : index
    %c0_8 = arith.constant 0 : index
    %6 = vector.load %arg9[%c0_7, %c0_8] : memref<128x768xf32, #tpu.memory_space<vmem>>, vector<128x768xf32>
    %cst = arith.constant dense<0.000000e+00> : vector<2x768xf32>
    %7 = tpu.matmul %3, %6, %cst {dimension_numbers = #tpu.dot_dimension_numbers<[1], [0], [0], [1], [0, 0, 1, 1], [], []>} : vector<2x128xf32>, vector<128x768xf32>, vector<2x768xf32> -> vector<2x768xf32>
    %c0_9 = arith.constant 0 : index
    %c0_10 = arith.constant 0 : index
    %8 = vector.load %arg10[%c0_9, %c0_10] : memref<1x768xf32, #tpu.memory_space<vmem>>, vector<1x768xf32>
    %9 = vector.broadcast %8 : vector<1x768xf32> to vector<2x768xf32>
    %10 = arith.addf %7, %9 : vector<2x768xf32>
    %11 = vector.extract_strided_slice %10 {offsets = [0, 0], sizes = [2, 512], strides = [1, 1]} : vector<2x768xf32> to vector<2x512xf32>
    %12 = vector.extract_strided_slice %10 {offsets = [0, 512], sizes = [2, 128], strides = [1, 1]} : vector<2x768xf32> to vector<2x128xf32>
    %cst_11 = arith.constant 0.000000e+00 : f32
    %13 = vector.broadcast %cst_11 : f32 to vector<2x128xf32>
    %14 = arith.subf %13, %12 : vector<2x128xf32>
    %15 = math.exp %14 : vector<2x128xf32>
    %cst_12 = arith.constant 1.000000e+00 : f32
    %16 = vector.broadcast %cst_12 : f32 to vector<2x128xf32>
    %17 = arith.addf %16, %15 : vector<2x128xf32>
    %cst_13 = arith.constant 1.000000e+00 : f32
    %18 = vector.broadcast %cst_13 : f32 to vector<2x128xf32>
    %19 = arith.divf %18, %17 : vector<2x128xf32>
    %20 = vector.extract_strided_slice %10 {offsets = [0, 640], sizes = [2, 64], strides = [1, 1]} : vector<2x768xf32> to vector<2x64xf32>
    %c0_14 = arith.constant 0 : index
    %c0_15 = arith.constant 0 : index
    %c0_16 = arith.constant 0 : index
    %21 = vector.load %arg17[%c0_14, %c0_15, %c0_16] : memref<2x16x64xf32, #tpu.memory_space<vmem>>, vector<2x16x64xf32>
    %22 = vector.shape_cast %20 : vector<2x64xf32> to vector<2x1x64xf32>
    %23 = vector.broadcast %22 : vector<2x1x64xf32> to vector<2x16x64xf32>
    %24 = arith.addf %21, %23 : vector<2x16x64xf32>
    %cst_17 = arith.constant 0.000000e+00 : f32
    %25 = vector.broadcast %cst_17 : f32 to vector<2x16x64xf32>
    %26 = arith.maximumf %24, %25 : vector<2x16x64xf32>
    %c0_18 = arith.constant 0 : index
    %c0_19 = arith.constant 0 : index
    %27 = vector.load %arg5[%c0_18, %c0_19] : memref<1x64xf32, #tpu.memory_space<vmem>>, vector<1x64xf32>
    %28 = vector.shape_cast %27 : vector<1x64xf32> to vector<1x1x64xf32>
    %29 = vector.broadcast %28 : vector<1x1x64xf32> to vector<2x16x64xf32>
    %30 = arith.mulf %26, %29 : vector<2x16x64xf32>
    %cst_20 = arith.constant dense<0.000000e+00> : vector<2x16xf32>
    %31 = vector.multi_reduction <add>, %30, %cst_20 [2] : vector<2x16x64xf32> to vector<2x16xf32>
    %c0_21 = arith.constant 0 : index
    %c0_22 = arith.constant 0 : index
    %32 = vector.load %arg6[%c0_21, %c0_22] : memref<1x1xf32, #tpu.memory_space<vmem>>, vector<1x1xf32>
    %33 = vector.broadcast %32 : vector<1x1xf32> to vector<2x16xf32>
    %34 = arith.addf %31, %33 : vector<2x16xf32>
    %cst_23 = arith.constant dense<0xFF800000> : vector<2xf32>
    %35 = vector.multi_reduction <maximumf>, %34, %cst_23 [1] : vector<2x16xf32> to vector<2xf32>
    %36 = vector.shape_cast %35 : vector<2xf32> to vector<2x1xf32>
    %37 = vector.broadcast %36 : vector<2x1xf32> to vector<2x16xf32>
    %38 = arith.subf %34, %37 : vector<2x16xf32>
    %39 = math.exp %38 : vector<2x16xf32>
    %cst_24 = arith.constant dense<0.000000e+00> : vector<2xf32>
    %40 = vector.multi_reduction <add>, %39, %cst_24 [1] : vector<2x16xf32> to vector<2xf32>
    %41 = vector.shape_cast %40 : vector<2xf32> to vector<2x1xf32>
    %42 = vector.broadcast %41 : vector<2x1xf32> to vector<2x16xf32>
    %43 = arith.divf %39, %42 : vector<2x16xf32>
    %44 = vector.shape_cast %43 : vector<2x16xf32> to vector<2x16x1xf32>
    %45 = vector.broadcast %44 : vector<2x16x1xf32> to vector<2x16x128xf32>
    %46 = arith.mulf %5, %45 : vector<2x16x128xf32>
    %cst_25 = arith.constant dense<0.000000e+00> : vector<2x128xf32>
    %47 = vector.multi_reduction <add>, %46, %cst_25 [1] : vector<2x16x128xf32> to vector<2x128xf32>
    %48 = arith.mulf %19, %47 : vector<2x128xf32>
    %c0_26 = arith.constant 0 : index
    %c0_27 = arith.constant 0 : index
    %c0_28 = arith.constant 0 : index
    %49 = vector.load %arg2[%c0_26, %c0_27, %c0_28] : memref<1x2x32xf32, #tpu.memory_space<vmem>>, vector<1x2x32xf32>
    %50 = vector.shape_cast %49 : vector<1x2x32xf32> to vector<2x32xf32>
    %c0_29 = arith.constant 0 : index
    %c0_30 = arith.constant 0 : index
    %51 = vector.load %arg11[%c0_29, %c0_30] : memref<32x512xf32, #tpu.memory_space<vmem>>, vector<32x512xf32>
    %cst_31 = arith.constant dense<0.000000e+00> : vector<2x512xf32>
    %52 = tpu.matmul %50, %51, %cst_31 {dimension_numbers = #tpu.dot_dimension_numbers<[1], [0], [0], [1], [0, 0, 1, 1], [], []>} : vector<2x32xf32>, vector<32x512xf32>, vector<2x512xf32> -> vector<2x512xf32>
    %c0_32 = arith.constant 0 : index
    %c0_33 = arith.constant 0 : index
    %53 = vector.load %arg12[%c0_32, %c0_33] : memref<128x512xf32, #tpu.memory_space<vmem>>, vector<128x512xf32>
    %cst_34 = arith.constant dense<0.000000e+00> : vector<2x512xf32>
    %54 = tpu.matmul %48, %53, %cst_34 {dimension_numbers = #tpu.dot_dimension_numbers<[1], [0], [0], [1], [0, 0, 1, 1], [], []>} : vector<2x128xf32>, vector<128x512xf32>, vector<2x512xf32> -> vector<2x512xf32>
    %55 = arith.addf %52, %54 : vector<2x512xf32>
    %56 = arith.addf %55, %11 : vector<2x512xf32>
    %57 = vector.extract_strided_slice %56 {offsets = [0, 0], sizes = [2, 128], strides = [1, 1]} : vector<2x512xf32> to vector<2x128xf32>
    %cst_35 = arith.constant 0.000000e+00 : f32
    %58 = vector.broadcast %cst_35 : f32 to vector<2x128xf32>
    %59 = arith.subf %58, %57 : vector<2x128xf32>
    %60 = math.exp %59 : vector<2x128xf32>
    %cst_36 = arith.constant 1.000000e+00 : f32
    %61 = vector.broadcast %cst_36 : f32 to vector<2x128xf32>
    %62 = arith.addf %61, %60 : vector<2x128xf32>
    %cst_37 = arith.constant 1.000000e+00 : f32
    %63 = vector.broadcast %cst_37 : f32 to vector<2x128xf32>
    %64 = arith.divf %63, %62 : vector<2x128xf32>
    %65 = vector.extract_strided_slice %56 {offsets = [0, 128], sizes = [2, 128], strides = [1, 1]} : vector<2x512xf32> to vector<2x128xf32>
    %cst_38 = arith.constant 0.000000e+00 : f32
    %66 = vector.broadcast %cst_38 : f32 to vector<2x128xf32>
    %67 = arith.subf %66, %65 : vector<2x128xf32>
    %68 = math.exp %67 : vector<2x128xf32>
    %cst_39 = arith.constant 1.000000e+00 : f32
    %69 = vector.broadcast %cst_39 : f32 to vector<2x128xf32>
    %70 = arith.addf %69, %68 : vector<2x128xf32>
    %cst_40 = arith.constant 1.000000e+00 : f32
    %71 = vector.broadcast %cst_40 : f32 to vector<2x128xf32>
    %72 = arith.divf %71, %70 : vector<2x128xf32>
    %73 = vector.extract_strided_slice %56 {offsets = [0, 256], sizes = [2, 128], strides = [1, 1]} : vector<2x512xf32> to vector<2x128xf32>
    %74 = math.tanh %73 : vector<2x128xf32>
    %75 = vector.extract_strided_slice %56 {offsets = [0, 384], sizes = [2, 128], strides = [1, 1]} : vector<2x512xf32> to vector<2x128xf32>
    %cst_41 = arith.constant 0.000000e+00 : f32
    %76 = vector.broadcast %cst_41 : f32 to vector<2x128xf32>
    %77 = arith.subf %76, %75 : vector<2x128xf32>
    %78 = math.exp %77 : vector<2x128xf32>
    %cst_42 = arith.constant 1.000000e+00 : f32
    %79 = vector.broadcast %cst_42 : f32 to vector<2x128xf32>
    %80 = arith.addf %79, %78 : vector<2x128xf32>
    %cst_43 = arith.constant 1.000000e+00 : f32
    %81 = vector.broadcast %cst_43 : f32 to vector<2x128xf32>
    %82 = arith.divf %81, %80 : vector<2x128xf32>
    %83 = arith.mulf %72, %4 : vector<2x128xf32>
    %84 = arith.mulf %64, %74 : vector<2x128xf32>
    %85 = arith.addf %83, %84 : vector<2x128xf32>
    %86 = math.tanh %85 : vector<2x128xf32>
    %87 = arith.mulf %82, %86 : vector<2x128xf32>
    %c0_44 = arith.constant 0 : index
    %c0_45 = arith.constant 0 : index
    %88 = vector.load %arg18[%c0_44, %c0_45] : memref<2x128xf32, #tpu.memory_space<vmem>>, vector<2x128xf32>
    tpu.vector_store %arg18[%c0_44, %c0_45], %87 {strides = array<i32>} : memref<2x128xf32, #tpu.memory_space<vmem>>, vector<2x128xf32>,
    %c0_46 = arith.constant 0 : index
    %c0_47 = arith.constant 0 : index
    %89 = vector.load %arg19[%c0_46, %c0_47] : memref<2x128xf32, #tpu.memory_space<vmem>>, vector<2x128xf32>
    tpu.vector_store %arg19[%c0_46, %c0_47], %85 {strides = array<i32>} : memref<2x128xf32, #tpu.memory_space<vmem>>, vector<2x128xf32>,
    %c0_48 = arith.constant 0 : index
    %c0_49 = arith.constant 0 : index
    %90 = vector.load %arg13[%c0_48, %c0_49] : memref<128x128xf32, #tpu.memory_space<vmem>>, vector<128x128xf32>
    %cst_50 = arith.constant dense<0.000000e+00> : vector<2x128xf32>
    %91 = tpu.matmul %87, %90, %cst_50 {dimension_numbers = #tpu.dot_dimension_numbers<[1], [0], [0], [1], [0, 0, 1, 1], [], []>} : vector<2x128xf32>, vector<128x128xf32>, vector<2x128xf32> -> vector<2x128xf32>
    %c0_51 = arith.constant 0 : index
    %c0_52 = arith.constant 0 : index
    %92 = vector.load %arg14[%c0_51, %c0_52] : memref<1x128xf32, #tpu.memory_space<vmem>>, vector<1x128xf32>
    %93 = vector.broadcast %92 : vector<1x128xf32> to vector<2x128xf32>
    %94 = arith.addf %91, %93 : vector<2x128xf32>
    %c0_53 = arith.constant 0 : index
    %c0_54 = arith.constant 0 : index
    %c0_55 = arith.constant 0 : index
    %95 = vector.load %arg15[%c0_53, %c0_54, %c0_55] : memref<1x2x128xf32, #tpu.memory_space<vmem>>, vector<1x2x128xf32>
    %96 = vector.shape_cast %95 : vector<1x2x128xf32> to vector<2x128xf32>
    %97 = vector.shape_cast %94 : vector<2x128xf32> to vector<1x2x128xf32>
    tpu.vector_store %arg15[%c0_53, %c0_54, %c0_55], %97 {strides = array<i32>} : memref<1x2x128xf32, #tpu.memory_space<vmem>>, vector<1x2x128xf32>,
    %c0_56 = arith.constant 0 : index
    %c0_57 = arith.constant 0 : index
    %c0_58 = arith.constant 0 : index
    %98 = vector.load %arg16[%c0_56, %c0_57, %c0_58] : memref<1x2x16xf32, #tpu.memory_space<vmem>>, vector<1x2x16xf32>
    %99 = vector.shape_cast %98 : vector<1x2x16xf32> to vector<2x16xf32>
    %100 = vector.shape_cast %43 : vector<2x16xf32> to vector<1x2x16xf32>
    tpu.vector_store %arg16[%c0_56, %c0_57, %c0_58], %100 {strides = array<i32>} : memref<1x2x16xf32, #tpu.memory_space<vmem>>, vector<1x2x16xf32>,
    return
  }
  func.func @transform_0(%arg0: i32) -> (i32, i32, i32) {
    %c0_i32 = arith.constant 0 : i32
    %c0_i32_0 = arith.constant 0 : i32
    %c0_i32_1 = arith.constant 0 : i32
    %c0_i32_2 = arith.constant 0 : i32
    return %c0_i32, %c0_i32_0, %c0_i32_1 : i32, i32, i32
  }
  func.func @transform_1(%arg0: i32) -> (i32, i32, i32) {
    %c0_i32 = arith.constant 0 : i32
    %c0_i32_0 = arith.constant 0 : i32
    %c0_i32_1 = arith.constant 0 : i32
    return %arg0, %c0_i32, %c0_i32_0 : i32, i32, i32
  }
  func.func @transform_2(%arg0: i32) -> (i32, i32) {
    %c0_i32 = arith.constant 0 : i32
    %c0_i32_0 = arith.constant 0 : i32
    %c0_i32_1 = arith.constant 0 : i32
    return %c0_i32, %c0_i32_0 : i32, i32
  }
  func.func @transform_3(%arg0: i32) -> (i32, i32) {
    %c0_i32 = arith.constant 0 : i32
    %c0_i32_0 = arith.constant 0 : i32
    %c0_i32_1 = arith.constant 0 : i32
    return %c0_i32, %c0_i32_0 : i32, i32
  }
  func.func @transform_4(%arg0: i32) -> (i32, i32) {
    %c0_i32 = arith.constant 0 : i32
    %c0_i32_0 = arith.constant 0 : i32
    %c0_i32_1 = arith.constant 0 : i32
    return %c0_i32, %c0_i32_0 : i32, i32
  }
  func.func @transform_5(%arg0: i32) -> (i32, i32) {
    %c0_i32 = arith.constant 0 : i32
    %c0_i32_0 = arith.constant 0 : i32
    %c0_i32_1 = arith.constant 0 : i32
    return %c0_i32, %c0_i32_0 : i32, i32
  }
  func.func @transform_6(%arg0: i32) -> (i32, i32) {
    %c0_i32 = arith.constant 0 : i32
    %c0_i32_0 = arith.constant 0 : i32
    %c0_i32_1 = arith.constant 0 : i32
    return %c0_i32, %c0_i32_0 : i32, i32
  }
  func.func @transform_7(%arg0: i32) -> (i32, i32) {
    %c0_i32 = arith.constant 0 : i32
    %c0_i32_0 = arith.constant 0 : i32
    %c0_i32_1 = arith.constant 0 : i32
    return %c0_i32, %c0_i32_0 : i32, i32
  }
  func.func @transform_8(%arg0: i32) -> (i32, i32) {
    %c0_i32 = arith.constant 0 : i32
    %c0_i32_0 = arith.constant 0 : i32
    %c0_i32_1 = arith.constant 0 : i32
    return %c0_i32, %c0_i32_0 : i32, i32
  }
  func.func @transform_9(%arg0: i32) -> (i32, i32) {
    %c0_i32 = arith.constant 0 : i32
    %c0_i32_0 = arith.constant 0 : i32
    %c0_i32_1 = arith.constant 0 : i32
    return %c0_i32, %c0_i32_0 : i32, i32
  }
  func.func @transform_10(%arg0: i32) -> (i32, i32) {
    %c0_i32 = arith.constant 0 : i32
    %c0_i32_0 = arith.constant 0 : i32
    %c0_i32_1 = arith.constant 0 : i32
    return %c0_i32, %c0_i32_0 : i32, i32
  }
  func.func @transform_11(%arg0: i32) -> (i32, i32) {
    %c0_i32 = arith.constant 0 : i32
    %c0_i32_0 = arith.constant 0 : i32
    %c0_i32_1 = arith.constant 0 : i32
    return %c0_i32, %c0_i32_0 : i32, i32
  }
  func.func @transform_12(%arg0: i32) -> (i32, i32) {
    %c0_i32 = arith.constant 0 : i32
    %c0_i32_0 = arith.constant 0 : i32
    %c0_i32_1 = arith.constant 0 : i32
    return %c0_i32, %c0_i32_0 : i32, i32
  }
  func.func @transform_13(%arg0: i32) -> (i32, i32) {
    %c0_i32 = arith.constant 0 : i32
    %c0_i32_0 = arith.constant 0 : i32
    %c0_i32_1 = arith.constant 0 : i32
    return %c0_i32, %c0_i32_0 : i32, i32
  }
  func.func @transform_14(%arg0: i32) -> (i32, i32, i32) {
    %c0_i32 = arith.constant 0 : i32
    %c0_i32_0 = arith.constant 0 : i32
    %c0_i32_1 = arith.constant 0 : i32
    return %arg0, %c0_i32, %c0_i32_0 : i32, i32, i32
  }
  func.func @transform_15(%arg0: i32) -> (i32, i32, i32) {
    %c0_i32 = arith.constant 0 : i32
    %c0_i32_0 = arith.constant 0 : i32
    %c0_i32_1 = arith.constant 0 : i32
    return %arg0, %c0_i32, %c0_i32_0 : i32, i32, i32
  }
}

</mosaic_0001>

<bundles_post_ra>
// kernel: decoder_forward.1
= control target key start
LH: loop header
LB: loop body
LE: loop exit
PB: predicated region body
PF: predicated region fallthrough
CT: control target
= control target key end

     0   :  { %s2230_s20 = smov 0   ;;  %s3163_s0 = inlined_call_operand.vmem [shape: f32[2,16,128], index: 0, kind: input, shape index: {}]   ;;  %s3164_s1 = inlined_call_operand.vmem [shape: f32[8,2,32], index: 1, kind: input, shape index: {}]   ;;  %s3165_s2 = inlined_call_operand.vmem [shape: f32[128,64], index: 2, kind: input, shape index: {}]   ;;  %s3166_s3 = inlined_call_operand.vmem [shape: f32[1,64], index: 3, kind: input, shape index: {}]   ;;  %s3167_s4 = inlined_call_operand.vmem [shape: f32[1,64], index: 4, kind: input, shape index: {}]   ;;  %s3168_s5 = inlined_call_operand.<no memory space> [shape: f32[1,1], index: 5, kind: input, shape index: {}]   ;;  %s3169_s6 = inlined_call_operand.vmem [shape: f32[128,256], index: 6, kind: input, shape index: {}]   ;;  %s3170_s7 = inlined_call_operand.vmem [shape: f32[1,256], index: 7, kind: input, shape index: {}]   ;;  %s3171_s8 = inlined_call_operand.vmem [shape: f32[128,768], index: 8, kind: input, shape index: {}]   ;;  %s3172_s9 = inlined_call_operand.vmem [shape: f32[1,768], index: 9, kind: input, shape index: {}]   ;;  %s3173_s10 = inlined_call_operand.vmem [shape: f32[32,512], index: 10, kind: input, shape index: {}]   ;;  %s3174_s11 = inlined_call_operand.vmem [shape: f32[128,512], index: 11, kind: input, shape index: {}]   ;;  %s3175_s12 = inlined_call_operand.vmem [shape: f32[128,128], index: 12, kind: input, shape index: {}]   ;;  %s3176_s13 = inlined_call_operand.vmem [shape: f32[1,128], index: 13, kind: input, shape index: {}]   ;;  %s3177_s14 = inlined_call_operand.vmem [shape: f32[8,2,128], index: 14, kind: output, shape index: {0}]   ;;  %s3178_s15 = inlined_call_operand.vmem [shape: f32[8,2,16], index: 15, kind: output, shape index: {1}]  }
   0x1   :  { %v21_v0 = vstv %s3168_s5 }
   0x2   :  { %22 = vst [vmem:[#allocation5] sm:$0x1] %v21_v0 }
   0x3 LB: > { %s1960_s21 = sadd.s32 4294967295, %s2140_s20   ;;  %p1964_p0 = scmp.ge.s32.totalorder %s2140_s20, 1  ;;  %s2140_s20 = sphi %s2230_s20, %s28_s20  }
   0x4   : > { %p441_p1 = scmp.lt.s32.totalorder %s2140_s20, 9 }
   0x6   : > { %p442_p2 = pnand %p1964_p0, %p441_p1 }
   0x7   : > { %p491_p3 = scmp.lt.s32.totalorder (!%p442_p2), %s1960_s21, 7  ;;  %p1968_p4 = scmp.ne.s32.totalorder (!%p442_p2), %s1960_s21, 0 }
   0x8   : > { %445 = sbr.rel (%p442_p2) target bundleno = 1754 (0x6da), region = 76 }
   0xd   : > { %s492_s22 = scalar_select %p491_p3, %s1960_s21, 7 }
   0xe   : > { %506 = sbr.rel (%p1968_p4) target bundleno = 254 (0xfe), region = 80 }
   0xf   : > { %s2238_s23 = sshll.u32 %s492_s22, 1 }
  0x10   : > { %s494_s25 = scalar_lea.vmem %s3164_s1, %s2238_s23  ;;  %s498_s28 = scalar_lea.vmem %s3177_s14, %s2238_s23 }
  0x11   : > { %s502_s16 = scalar_lea.vmem %s3178_s15, %s2238_s23 }
  0x13   : > { %v526_v1 = vld [vmem:[%s3165_s2 + $0x78] sm:$0xff]  ;;  %v525_v2 = vld [vmem:[%s3165_s2 + $0x70] sm:$0xff]  ;;  %v678_v5 = vld [vmem:[%s3169_s6 + $0xe8] sm:$0xff]  ;;  %vm695_vm0 = vcmask 1041409   ;;  %vm623_vm1 = vcmask 523264  }
  0x14   : > { %v680_v3 = vld [vmem:[%s3169_s6 + $0xf8] sm:$0xff]  ;;  %2014 = vmatprep.subr.mxu0 %v526_v1  ;;  %v679_v4 = vld [vmem:[%s3169_s6 + $0xf0] sm:$0xff]  ;;  %v524_v6 = vld [vmem:[%s3165_s2 + $0x68] sm:$0xff] }
  0x15   : > { %698 = vmatprep.subr.mxu1 %v680_v3  ;;  %2015 = vmatpush3.msra.mxu0 %v526_v1  ;;  %v677_v7 = vld [vmem:[%s3169_s6 + $0xe0] sm:$0xff]  ;;  %v676_v8 = vld [vmem:[%s3169_s6 + $0xd8] sm:$0xff]  ;;  %v675_v9 = vld [vmem:[%s3169_s6 + $0xd0] sm:$0xff] }
  0x16   : > { %699 = vmatpush1.msra.mxu1 %v679_v4  ;;  %2016 = vmatprep.subr.mxu0 %v525_v2  ;;  %v523_v10 = vld [vmem:[%s3165_s2 + $0x60] sm:$0xff]  ;;  %v674_v11 = vld [vmem:[%s3169_s6 + $0xc8] sm:$0xff]  ;;  %v522_v13 = vld [vmem:[%s3165_s2 + $0x58] sm:$0xff] }
  0x17   : > { %700 = vmatprep.subr.mxu1 %v678_v5  ;;  %2017 = vmatpush3.msra.mxu0 %v525_v2  ;;  %v673_v12 = vld [vmem:[%s3169_s6 + $0xc0] sm:$0xff]  ;;  %v672_v14 = vld [vmem:[%s3169_s6 + $0xb8] sm:$0xff]  ;;  %v671_v15 = vld [vmem:[%s3169_s6 + $0xb0] sm:$0xff]  ;;  %v2142_v5 = vmov 0.0  }
  0x18   : > { %701 = vmatpush1.msra.mxu1 %v677_v7  ;;  %2018 = vmatprep.subr.mxu0 %v524_v6  ;;  %v521_v16 = vld [vmem:[%s3165_s2 + $0x50] sm:$0xff]  ;;  %v670_v17 = vld [vmem:[%s3169_s6 + $0xa8] sm:$0xff]  ;;  %v669_v18 = vld [vmem:[%s3169_s6 + $0xa0] sm:$0xff]  ;;  %v683_v7 = vlaneseq }
  0x19   : > { %702 = vmatprep.subr.mxu1 %v676_v8  ;;  %2019 = vmatpush3.msra.mxu0 %v524_v6  ;;  %v520_v19 = vld [vmem:[%s3165_s2 + $0x48] sm:$0xff]  ;;  %v668_v20 = vld [vmem:[%s3169_s6 + $0x98] sm:$0xff]  ;;  %v667_v21 = vld [vmem:[%s3169_s6 + $0x90] sm:$0xff] }
  0x1a   : > { %703 = vmatpush1.msra.mxu1 %v675_v9  ;;  %2020 = vmatprep.subr.mxu0 %v523_v10  ;;  %v519_v22 = vld [vmem:[%s3165_s2 + $0x40] sm:$0xff]  ;;  %v666_v23 = vld [vmem:[%s3169_s6 + $0x88] sm:$0xff]  ;;  %v518_v25 = vld [vmem:[%s3165_s2 + $0x38] sm:$0xff]  ;;  %v684_v8 = vshrl.u32 %v683_v7, 7 }
  0x1b   : > { %704 = vmatprep.subr.mxu1 %v674_v11  ;;  %2021 = vmatpush3.msra.mxu0 %v523_v10  ;;  %v665_v24 = vld [vmem:[%s3169_s6 + $0x80] sm:$0xff]  ;;  %v664_v26 = vld [vmem:[%s3169_s6 + $0x78] sm:$0xff]  ;;  %v663_v27 = vld [vmem:[%s3169_s6 + $0x70] sm:$0xff] }
  0x1c   : > { %705 = vmatpush1.msra.mxu1 %v673_v12  ;;  %2022 = vmatprep.subr.mxu0 %v522_v13  ;;  %v2336_v28 = vld [vmem:[%s3163_s0] sm:$0xff]  ;;  %v2341_v29 = vld [vmem:[%s3163_s0 + $0x8] sm:$0xff]  ;;  %v517_v30 = vld [vmem:[%s3165_s2 + $0x30] sm:$0xff]  ;;  %v685_v9 = vsub.s32 0, %v684_v8  ;;  %v689_v11 = vsub.s32 1, %v684_v8 }
  0x1d   : > { %706 = vmatprep.subr.mxu1 %v672_v14  ;;  %2023 = vmatpush3.msra.mxu0 %v522_v13  ;;  %v662_v31 = vld [vmem:[%s3169_s6 + $0x68] sm:$0xff]  ;;  %v2352_v32 = vld [vmem:[%s3163_s0 + $0x10] sm:$0xff]  ;;  %v632_v33 = vadd.f32 %v2341_v29, %v2336_v28  ;;  %v661_v34 = vld [vmem:[%s3169_s6 + $0x60] sm:$0xff] }
  0x1e   : > { %707 = vmatpush1.msra.mxu1 %v671_v15  ;;  %2024 = vmatprep.subr.mxu0 %v521_v16  ;;  %v2362_v35 = vld [vmem:[%s3163_s0 + $0x18] sm:$0xff]  ;;  %v516_v36 = vld [vmem:[%s3165_s2 + $0x28] sm:$0xff]  ;;  %v659_v40 = vld [vmem:[%s3169_s6 + $0x50] sm:$0xff] }
  0x1f   : > { %708 = vmatprep.subr.mxu1 %v670_v17  ;;  %2025 = vmatpush3.msra.mxu0 %v521_v16  ;;  %v660_v37 = vld [vmem:[%s3169_s6 + $0x58] sm:$0xff]  ;;  %v633_v38 = vrot.slane %v632_v33, 4  ;;  %v639_v39 = vadd.f32 %v2362_v35, %v2352_v32  ;;  %v515_v41 = vld [vmem:[%s3165_s2 + $0x20] sm:$0xff]  ;;  %v658_v42 = vld [vmem:[%s3169_s6 + $0x48] sm:$0xff] }
  0x20   : > { %709 = vmatpush1.msra.mxu1 %v669_v18  ;;  %2026 = vmatprep.subr.mxu0 %v520_v19  ;;  %v657_v45 = vld [vmem:[%s3169_s6 + $0x40] sm:$0xff]  ;;  %v514_v46 = vld [vmem:[%s3165_s2 + $0x18] sm:$0xff]  ;;  %v655_v50 = vld [vmem:[%s3169_s6 + $0x30] sm:$0xff] }
  0x21   : > { %710 = vmatprep.subr.mxu1 %v668_v20  ;;  %2027 = vmatpush3.msra.mxu0 %v520_v19  ;;  %v634_v43 = vadd.f32 %v633_v38, %v632_v33  ;;  %v640_v44 = vrot.slane %v639_v39, 4  ;;  %v656_v47 = vld [vmem:[%s3169_s6 + $0x38] sm:$0xff]  ;;  %v513_v51 = vld [vmem:[%s3165_s2 + $0x10] sm:$0xff]  ;;  %v654_v52 = vld [vmem:[%s3169_s6 + $0x28] sm:$0xff] }
  0x22   : > { %711 = vmatpush1.msra.mxu1 %v667_v21  ;;  %2028 = vmatprep.subr.mxu0 %v519_v22  ;;  %v653_v55 = vld [vmem:[%s3169_s6 + $0x20] sm:$0xff]  ;;  %v512_v56 = vld [vmem:[%s3165_s2 + $0x8] sm:$0xff]  ;;  %v652_v57 = vld [vmem:[%s3169_s6 + $0x18] sm:$0xff] }
  0x23   : > { %712 = vmatprep.subr.mxu1 %v666_v23  ;;  %2029 = vmatpush3.msra.mxu0 %v519_v22  ;;  %v635_v48 = vrot.slane %v634_v43, 2  ;;  %v641_v49 = vadd.f32 %v640_v44, %v639_v39  ;;  %v511_v60 = vld [vmem:[%s3165_s2] sm:$0xff]  ;;  %v651_v61 = vld [vmem:[%s3169_s6 + $0x10] sm:$0xff]  ;;  %v650_v0 = vld [vmem:[%s3169_s6 + $0x8] sm:$0xff] }
  0x24   : > { %713 = vmatpush1.msra.mxu1 %v665_v24  ;;  %2030 = vmatprep.subr.mxu0 %v518_v25  ;;  %v649_v1 = vld [vmem:[%s3169_s6] sm:$0xff] }
  0x25   : > { %714 = vmatprep.subr.mxu1 %v664_v26  ;;  %2031 = vmatpush3.msra.mxu0 %v518_v25  ;;  %v636_v53 = vadd.f32 %v635_v48, %v634_v43  ;;  %v642_v54 = vrot.slane %v641_v49, 2  ;;  %v681_v10 = vld [vmem:[%s3170_s7] sm:$0x3] }
  0x26   : > { %715 = vmatpush1.msra.mxu1 %v663_v27  ;;  %2032 = vmatprep.subr.mxu0 %v517_v30  ;;  %v1969_v12 = vld [vmem:[%s3166_s3] ss:$0 sm:$0xff]  ;;  %v686_v13 = vrot.slane %v681_v10, %v685_v9  ;;  %v690_v16 = vrot.slane %v681_v10, %v689_v11 }
  0x27   : > { %716 = vmatprep.subr.mxu1 %v662_v31  ;;  %2033 = vmatpush3.msra.mxu0 %v517_v30  ;;  %v637_v58 = vrot.slane %v636_v53, 1  ;;  %v643_v59 = vadd.f32 %v642_v54, %v641_v49 }
  0x28   : > { %717 = vmatpush1.msra.mxu1 %v661_v34  ;;  %2034 = vmatprep.subr.mxu0 %v516_v36 }
  0x29   : > { %718 = vmatprep.subr.mxu1 %v660_v37  ;;  %2035 = vmatpush3.msra.mxu0 %v516_v36  ;;  %v638_v62 = vadd.f32 %v637_v58, %v636_v53  ;;  %v644_v63 = vrot.slane %v643_v59, 1 }
  0x2a   : > { %719 = vmatpush1.msra.mxu1 %v659_v40  ;;  %2036 = vmatprep.subr.mxu0 %v515_v41 }
  0x2b   : > { %720 = vmatprep.subr.mxu1 %v658_v42  ;;  %2037 = vmatpush3.msra.mxu0 %v515_v41  ;;  %v645_v2 = vadd.f32 %v644_v63, %v643_v59  ;;  %v647_v3 = vmul.f32 0.0625, %v638_v62 }
  0x2c   : > { %721 = vmatpush1.msra.mxu1 %v657_v45  ;;  %2038 = vmatprep.subr.mxu0 %v514_v46 }
  0x2d   : > { %722 = vmatprep.subr.mxu1 %v656_v47  ;;  %2039 = vmatpush3.msra.mxu0 %v514_v46  ;;  %v648_v4 = vmul.f32 0.0625, %v645_v2 }
  0x2e   : > { %723 = vmatpush1.msra.mxu1 %v655_v50  ;;  %2040 = vmatprep.subr.mxu0 %v513_v51 }
  0x2f   : > { %724 = vmatprep.subr.mxu1 %v654_v52  ;;  %2041 = vmatpush3.msra.mxu0 %v513_v51  ;;  %v696_v6 = vsel %vm695_vm0, %v648_v4, %v647_v3 }
  0x30   : > { %725 = vmatpush1.msra.mxu1 %v653_v55  ;;  %2042 = vmatprep.subr.mxu0 %v512_v56 }
  0x31   : > { %726 = vmatprep.subr.mxu1 %v652_v57  ;;  %2043 = vmatpush3.msra.mxu0 %v512_v56 }
  0x32   : > { %2046 = vmatprep.mubr.f32.mxu0 %v2336_v28  ;;  %2044 = vmatprep.subr.mxu0 %v511_v60 }
  0x33   : > { %727 = vmatpush1.msra.mxu1 %v651_v61  ;;  %2045 = vmatpush3.msra.mxu0 %v511_v60 }
  0x34   : > { %728 = vmatprep.subr.mxu1 %v650_v0  ;;  %2047 = vmatmul.mubr.f32.vlgmr.msra.gmra.mxu0 %v2341_v29 }
  0x35   : > { %729 = vmatpush1.msra.mxu1 %v649_v1  ;;  %762 = vmatprep.mubr.f32.mxu1 %v2142_v5 }
  0x36   : > { %2049 = vmatprep.mubr.f32.mxu0 %v2352_v32  ;;  %763 = vmatmul.mubr.f32.vlgmr.msra.gmra.mxu1 %v696_v6 }
  0x38   : > { %2050 = vmatmul.mubr.f32.gmra.mxu0 %v2362_v35 }
  0xf4   : > { %v2048_v14 = vpop.f32.mrf.mxu0 }
  0xf5   : > { %v620_v15 = vadd.f32 %v2048_v14, %v1969_v12 }
  0xf6   : > { %v593_v17 = vpop.f32.mrf.mxu0  ;;  %v764_v18 = vpop.f32.mrf.mxu1 }
  0xf7   : > { %625 = vst.msk [vmem:[#allocation2 + $0x8] sm:$0xff] %vm623_vm1, %v620_v15  ;;  %v619_v19 = vadd.f32 %v1969_v12, %v593_v17  ;;  %v765_v20 = vadd.f32 %v764_v18, %v686_v13 }
  0xf8   : > { %v2051_v21 = vpop.f32.mrf.mxu0  ;;  %v766_v22 = vpop.f32.mrf.mxu1 }
  0xf9   : > { %624 = vst.msk [vmem:[#allocation2] sm:$0xff] %vm623_vm1, %v619_v19  ;;  %769 = vst [vmem:[#allocation3] sm:$0x3] %v765_v20  ;;  %v622_v23 = vadd.f32 %v2051_v21, %v1969_v12  ;;  %v767_v24 = vadd.f32 %v766_v22, %v690_v16 }
  0xfa   : > { %v603_v25 = vpop.f32.mrf.mxu0 }
  0xfb   : > { %627 = vst.msk [vmem:[#allocation2 + $0x18] sm:$0xff] %vm623_vm1, %v622_v23  ;;  %770 = vst [vmem:[#allocation4] sm:$0x3] %v767_v24  ;;  %v621_v26 = vadd.f32 %v1969_v12, %v603_v25 }
  0xfd   : > { %626 = vst.msk [vmem:[#allocation2 + $0x10] sm:$0xff] %vm623_vm1, %v621_v26 }
  0xfe PF: > { %v868_v27 = vld [vmem:[%s3171_s8 + $0x2d8] sm:$0xff]  ;;  %v867_v28 = vld [vmem:[%s3171_s8 + $0x2d0] sm:$0xff]  ;;  %v862_v29 = vld [vmem:[%s3171_s8 + $0x2a8] sm:$0xff]  ;;  %v2143_v31 = vmov 0.0   ;;  %vm1180_vm2 = vcmask 523264   ;;  %vm1222_vm3 = vcmask 130112  }
  0xff   : > { %905 = vmatprep.subr.mxu0 %v868_v27  ;;  %v861_v30 = vld [vmem:[%s3171_s8 + $0x2a0] sm:$0xff]  ;;  %969 = vmatprep.mubr.f32.mxu0 %v2143_v31  ;;  %v856_v32 = vld [vmem:[%s3171_s8 + $0x278] sm:$0xff]  ;;  %v855_v33 = vld [vmem:[%s3171_s8 + $0x270] sm:$0xff]  ;;  %vm1233_vm4 = vcmask 1041409   ;;  %vm1236_vm5 = vcmask 123904   ;;  %vm1585_vm6 = vcmask 261120  }
 0x100   : > { %906 = vmatpush1.msra.mxu0 %v867_v28  ;;  %1040 = vmatprep.mubr.f32.mxu1 %v2143_v31  ;;  %v850_v34 = vld [vmem:[%s3171_s8 + $0x248] sm:$0xff]  ;;  %v849_v35 = vld [vmem:[%s3171_s8 + $0x240] sm:$0xff]  ;;  %v844_v36 = vld [vmem:[%s3171_s8 + $0x218] sm:$0xff]  ;;  %vm2146_vm7 = vmmov 0  }
 0x101   : > { %907 = vmatprep.subr.mxu0 %v862_v29  ;;  %v843_v37 = vld [vmem:[%s3171_s8 + $0x210] sm:$0xff]  ;;  %v838_v38 = vld [vmem:[%s3171_s8 + $0x1e8] sm:$0xff]  ;;  %v837_v39 = vld [vmem:[%s3171_s8 + $0x1e0] sm:$0xff]  ;;  %v2144_v29 = vmov 0  }
 0x102   : > { %908 = vmatpush1.msra.mxu0 %v861_v30  ;;  %v832_v40 = vld [vmem:[%s3171_s8 + $0x1b8] sm:$0xff]  ;;  %v831_v41 = vld [vmem:[%s3171_s8 + $0x1b0] sm:$0xff]  ;;  %v826_v42 = vld [vmem:[%s3171_s8 + $0x188] sm:$0xff]  ;;  %2100 = vset.pattern.permute.xlu0 %v2144_v29  ;;  %v875_v30 = vlaneseq }
 0x103   : > { %909 = vmatprep.subr.mxu0 %v856_v32  ;;  %v825_v43 = vld [vmem:[%s3171_s8 + $0x180] sm:$0xff]  ;;  %v820_v44 = vld [vmem:[%s3171_s8 + $0x158] sm:$0xff]  ;;  %v819_v45 = vld [vmem:[%s3171_s8 + $0x150] sm:$0xff]  ;;  %2101 = vset.pattern.permute.xlu1 %v2144_v29 }
 0x104   : > { %910 = vmatpush1.msra.mxu0 %v855_v33  ;;  %v814_v46 = vld [vmem:[%s3171_s8 + $0x128] sm:$0xff]  ;;  %v813_v47 = vld [vmem:[%s3171_s8 + $0x120] sm:$0xff]  ;;  %v808_v48 = vld [vmem:[%s3171_s8 + $0xf8] sm:$0xff]  ;;  %v2634_v32 = vshrl.u32 %v875_v30, 7  ;;  %v2145_v33 = vmov 1966171168  }
 0x105   : > { %911 = vmatprep.subr.mxu0 %v850_v34  ;;  %v807_v49 = vld [vmem:[%s3171_s8 + $0xf0] sm:$0xff]  ;;  %v802_v50 = vld [vmem:[%s3171_s8 + $0xc8] sm:$0xff]  ;;  %v801_v51 = vld [vmem:[%s3171_s8 + $0xc0] sm:$0xff]  ;;  %v1130_v34 = vunpack.c.l.s4 %v2145_v33 }
 0x106   : > { %912 = vmatpush1.msra.mxu0 %v849_v35  ;;  %v796_v52 = vld [vmem:[%s3171_s8 + $0x98] sm:$0xff]  ;;  %v795_v53 = vld [vmem:[%s3171_s8 + $0x90] sm:$0xff]  ;;  %v790_v54 = vld [vmem:[%s3171_s8 + $0x68] sm:$0xff] }
 0x107   : > { %913 = vmatprep.subr.mxu0 %v844_v36  ;;  %v789_v55 = vld [vmem:[%s3171_s8 + $0x60] sm:$0xff]  ;;  %v784_v56 = vld [vmem:[%s3171_s8 + $0x38] sm:$0xff]  ;;  %v783_v57 = vld [vmem:[%s3171_s8 + $0x30] sm:$0xff]  ;;  %v897_v36 = vsub.s32 5, %v2634_v32 }
 0x108   : > { %914 = vmatpush1.msra.mxu0 %v843_v37  ;;  %v778_v58 = vld [vmem:[%s3171_s8 + $0x8] sm:$0xff]  ;;  %v777_v59 = vld [vmem:[%s3171_s8] sm:$0xff]  ;;  %v872_v61 = vld [vmem:[%s3171_s8 + $0x2f8] sm:$0xff]  ;;  %v1131_v37 = vunpack.c.0.s8 %v1130_v34 }
 0x109   : > { %915 = vmatprep.subr.mxu0 %v838_v38  ;;  %v2532_v60 = vld [vmem:[#allocation3] sm:$0x3]  ;;  %v871_v62 = vld [vmem:[%s3171_s8 + $0x2f0] sm:$0xff]  ;;  %v866_v63 = vld [vmem:[%s3171_s8 + $0x2c8] sm:$0xff] }
 0x10a   : > { %916 = vmatpush1.msra.mxu0 %v837_v39  ;;  %v865_v0 = vld [vmem:[%s3171_s8 + $0x2c0] sm:$0xff]  ;;  %v860_v1 = vld [vmem:[%s3171_s8 + $0x298] sm:$0xff]  ;;  %v859_v2 = vld [vmem:[%s3171_s8 + $0x290] sm:$0xff] }
 0x10b   : > { %917 = vmatprep.subr.mxu0 %v832_v40  ;;  %v854_v3 = vld [vmem:[%s3171_s8 + $0x268] sm:$0xff]  ;;  %v853_v4 = vld [vmem:[%s3171_s8 + $0x260] sm:$0xff]  ;;  %v848_v5 = vld [vmem:[%s3171_s8 + $0x238] sm:$0xff] }
 0x10c   : > { %918 = vmatpush1.msra.mxu0 %v831_v41  ;;  %v847_v6 = vld [vmem:[%s3171_s8 + $0x230] sm:$0xff]  ;;  %v842_v7 = vld [vmem:[%s3171_s8 + $0x208] sm:$0xff]  ;;  %v841_v8 = vld [vmem:[%s3171_s8 + $0x200] sm:$0xff] }
 0x10d   : > { %919 = vmatprep.subr.mxu0 %v826_v42  ;;  %v836_v9 = vld [vmem:[%s3171_s8 + $0x1d8] sm:$0xff]  ;;  %v835_v10 = vld [vmem:[%s3171_s8 + $0x1d0] sm:$0xff]  ;;  %v830_v11 = vld [vmem:[%s3171_s8 + $0x1a8] sm:$0xff]  ;;  %v1134_v42 = vsub.s32 %v1131_v37, %v2634_v32 }
 0x10e   : > { %920 = vmatpush1.msra.mxu0 %v825_v43  ;;  %v829_v12 = vld [vmem:[%s3171_s8 + $0x1a0] sm:$0xff]  ;;  %v824_v13 = vld [vmem:[%s3171_s8 + $0x178] sm:$0xff]  ;;  %v823_v14 = vld [vmem:[%s3171_s8 + $0x170] sm:$0xff] }
 0x10f   : > { %921 = vmatprep.subr.mxu0 %v820_v44  ;;  %v818_v15 = vld [vmem:[%s3171_s8 + $0x148] sm:$0xff]  ;;  %v817_v16 = vld [vmem:[%s3171_s8 + $0x140] sm:$0xff]  ;;  %v812_v17 = vld [vmem:[%s3171_s8 + $0x118] sm:$0xff] }
 0x110   : > { %922 = vmatpush1.msra.mxu0 %v819_v45  ;;  %v811_v18 = vld [vmem:[%s3171_s8 + $0x110] sm:$0xff]  ;;  %v806_v19 = vld [vmem:[%s3171_s8 + $0xe8] sm:$0xff]  ;;  %v805_v20 = vld [vmem:[%s3171_s8 + $0xe0] sm:$0xff] }
 0x111   : > { %923 = vmatprep.subr.mxu0 %v814_v46  ;;  %v800_v21 = vld [vmem:[%s3171_s8 + $0xb8] sm:$0xff]  ;;  %v799_v22 = vld [vmem:[%s3171_s8 + $0xb0] sm:$0xff]  ;;  %v794_v23 = vld [vmem:[%s3171_s8 + $0x88] sm:$0xff]  ;;  %v2651_v46 = vsub.s32 0, %v2634_v32 }
 0x112   : > { %924 = vmatpush1.msra.mxu0 %v813_v47  ;;  %v793_v24 = vld [vmem:[%s3171_s8 + $0x80] sm:$0xff]  ;;  %v788_v25 = vld [vmem:[%s3171_s8 + $0x58] sm:$0xff]  ;;  %v787_v26 = vld [vmem:[%s3171_s8 + $0x50] sm:$0xff] }
 0x113   : > { %925 = vmatprep.subr.mxu0 %v808_v48  ;;  %v782_v27 = vld [vmem:[%s3171_s8 + $0x28] sm:$0xff]  ;;  %v781_v28 = vld [vmem:[%s3171_s8 + $0x20] sm:$0xff] }
 0x114   : > { %926 = vmatpush1.msra.mxu0 %v807_v49  ;;  %v2642_v38 = vld [vmem:[%s3172_s9] sm:$0x3f] }
 0x115   : > { %927 = vmatprep.subr.mxu0 %v802_v50  ;;  %v898_v40 = vrot.slane %v2642_v38, %v897_v36  ;;  %v1124_v49 = vld [vmem:[#allocation2] sm:$0xff]  ;;  %v1125_v50 = vld [vmem:[#allocation2 + $0x8] sm:$0xff]  ;;  %v2673_v36 = vsub.s32 1, %v2634_v32 }
 0x116   : > { %928 = vmatpush1.msra.mxu0 %v801_v51 }
 0x117   : > { %929 = vmatprep.subr.mxu0 %v796_v52 }
 0x118   : > { %930 = vmatpush1.msra.mxu0 %v795_v53  ;;  %v1126_v53 = vld [vmem:[#allocation2 + $0x10] sm:$0xff] }
 0x119   : > { %931 = vmatprep.subr.mxu0 %v790_v54  ;;  %v1127_v54 = vld [vmem:[#allocation2 + $0x18] sm:$0xff] }
 0x11a   : > { %932 = vmatpush1.msra.mxu0 %v789_v55 }
 0x11b   : > { %933 = vmatprep.subr.mxu0 %v784_v56 }
 0x11c   : > { %934 = vmatpush1.msra.mxu0 %v783_v57 }
 0x11d   : > { %935 = vmatprep.subr.mxu0 %v778_v58  ;;  %v1970_v58 = vld [vmem:[%s3167_s4] ss:$0 sm:$0xff] }
 0x11e   : > { %936 = vmatpush1.msra.mxu0 %v777_v59 }
 0x11f   : > { %970 = vmatmul.mubr.f32.vlgmr.msra.gmra.mxu0 %v2532_v60  ;;  %1047 = vmatprep.subr.mxu0 %v872_v61 }
 0x120   : > { %1048 = vmatpush1.msra.mxu0 %v871_v62  ;;  %1111 = vmatprep.mubr.f32.mxu0 %v2143_v31 }
 0x121   : > { %1049 = vmatprep.subr.mxu0 %v866_v63 }
 0x122   : > { %1050 = vmatpush1.msra.mxu0 %v865_v0 }
 0x123   : > { %1051 = vmatprep.subr.mxu0 %v860_v1 }
 0x124   : > { %1052 = vmatpush1.msra.mxu0 %v859_v2 }
 0x125   : > { %1053 = vmatprep.subr.mxu0 %v854_v3 }
 0x126   : > { %1054 = vmatpush1.msra.mxu0 %v853_v4 }
 0x127   : > { %1055 = vmatprep.subr.mxu0 %v848_v5 }
 0x128   : > { %1056 = vmatpush1.msra.mxu0 %v847_v6 }
 0x129   : > { %1057 = vmatprep.subr.mxu0 %v842_v7 }
 0x12a   : > { %1058 = vmatpush1.msra.mxu0 %v841_v8 }
 0x12b   : > { %1059 = vmatprep.subr.mxu0 %v836_v9 }
 0x12c   : > { %1060 = vmatpush1.msra.mxu0 %v835_v10  ;;  %v1971_v10 = vld [vmem:[#allocation5] ss:$0 sm:$0xff] }
 0x12d   : > { %1061 = vmatprep.subr.mxu0 %v830_v11 }
 0x12e   : > { %1062 = vmatpush1.msra.mxu0 %v829_v12  ;;  %v1212_v12 = vand.u32 127, %v875_v30 }
 0x12f   : > { %1063 = vmatprep.subr.mxu0 %v824_v13 }
 0x130   : > { %1064 = vmatpush1.msra.mxu0 %v823_v14  ;;  %v1217_v14 = vadd.s32 4294967288, %v1212_v12 }
 0x131   : > { %1065 = vmatprep.subr.mxu0 %v818_v15 }
 0x132   : > { %1066 = vmatpush1.msra.mxu0 %v817_v16  ;;  %v2659_v16 = vsub.s32 %v1212_v12, %v2634_v32  ;;  %v846_v12 = vld [vmem:[%s3171_s8 + $0x228] sm:$0xff] }
 0x133   : > { %1067 = vmatprep.subr.mxu0 %v812_v17  ;;  %v2662_v17 = vsub.s32 %v1217_v14, %v2634_v32  ;;  %v840_v14 = vld [vmem:[%s3171_s8 + $0x1f8] sm:$0xff] }
 0x134   : > { %1068 = vmatpush1.msra.mxu0 %v811_v18 }
 0x135   : > { %1069 = vmatprep.subr.mxu0 %v806_v19 }
 0x136   : > { %1070 = vmatpush1.msra.mxu0 %v805_v20 }
 0x137   : > { %1071 = vmatprep.subr.mxu0 %v800_v21 }
 0x138   : > { %1072 = vmatpush1.msra.mxu0 %v799_v22 }
 0x139   : > { %1073 = vmatprep.subr.mxu0 %v794_v23 }
 0x13a   : > { %1074 = vmatpush1.msra.mxu0 %v793_v24 }
 0x13b   : > { %1075 = vmatprep.subr.mxu0 %v788_v25 }
 0x13c   : > { %1076 = vmatpush1.msra.mxu0 %v787_v26 }
 0x13d   : > { %1077 = vmatprep.subr.mxu0 %v782_v27 }
 0x13e   : > { %1078 = vmatpush1.msra.mxu0 %v781_v28 }
 0x13f   : > { %1112 = vmatmul.mubr.f32.vlgmr.msra.gmra.mxu0 %v2532_v60 }
 0x140   : > { %1578 = vmatprep.mubr.f32.mxu0 %v2143_v31 }
 0x1df   : > { %v2636_v35 = vpop.f32.mrf.mxu0 }
 0x1e1   : > { %v2644_v39 = vpop.f32.mrf.mxu0 }
 0x1ff   : > { %v2647_v41 = vpop.f32.mrf.mxu0 }
 0x201   : > { %v1115_v43 = vpop.f32.mrf.mxu0 }
 0x202   : > { %v1116_v44 = vadd.f32 %v1115_v43, %v898_v40 }
 0x204   : > { %v1135_v45 = vrot.slane %v1116_v44, %v1134_v42 }
 0x206   : > { %v1136_v47 = vcombine.high %v1135_v45, %v1135_v45  ;;  %v1143_v48 = vrot.slane %v1135_v45, %v1134_v42 }
 0x208   : > { %v1150_v51 = vrot.slane %v1136_v47, %v1134_v42  ;;  %v1154_v52 = vrot.slane %v1143_v48, %v2651_v46 }
 0x20a   : > { %v1161_v55 = vadd.f32 %v1154_v52, %v1124_v49  ;;  %v1158_v56 = vrot.slane %v1150_v51, %v2651_v46  ;;  %v1162_v57 = vadd.f32 %v1154_v52, %v1125_v50 }
 0x20c   : > { %v1165_v59 = vmax.f32 %v1161_v55, 0.0  ;;  %v1163_v61 = vadd.f32 %v1158_v56, %v1126_v53  ;;  %v1166_v62 = vmax.f32 %v1162_v57, 0.0  ;;  %v1164_v63 = vadd.f32 %v1158_v56, %v1127_v54 }
 0x20e   : > { %v1176_v0 = vmul.f32 %v1970_v58, %v1165_v59  ;;  %v1167_v1 = vmax.f32 %v1163_v61, 0.0  ;;  %v1168_v2 = vmax.f32 %v1164_v63, 0.0  ;;  %v1177_v5 = vmul.f32 %v1970_v58, %v1166_v62 }
 0x210   : > { %v1181_v3 = vsel %vm1180_vm2, %v1176_v0, 0.0  ;;  %v1178_v4 = vmul.f32 %v1970_v58, %v1167_v1  ;;  %v1179_v7 = vmul.f32 %v1970_v58, %v1168_v2  ;;  %v1184_v8 = vsel %vm1180_vm2, %v1177_v5, 0.0  ;;  %v869_v5 = vld [vmem:[%s3171_s8 + $0x2e0] sm:$0xff] }
 0x211   : > { %1182 = vadd.xlane.f32.xlu0 %v1181_v3 }
 0x212   : > { %v1187_v6 = vsel %vm1180_vm2, %v1178_v4, 0.0  ;;  %v1190_v9 = vsel %vm1180_vm2, %v1179_v7, 0.0  ;;  %v870_v4 = vld [vmem:[%s3171_s8 + $0x2e8] sm:$0xff]  ;;  %v863_v7 = vld [vmem:[%s3171_s8 + $0x2b0] sm:$0xff] }
 0x213   : > { %1188 = vadd.xlane.f32.xlu1 %v1187_v6  ;;  %v864_v6 = vld [vmem:[%s3171_s8 + $0x2b8] sm:$0xff]  ;;  %976 = vmatprep.subr.mxu1 %v870_v4 }
 0x214   : > { %977 = vmatpush1.msra.mxu1 %v869_v5  ;;  %v1430_v4 = vld [vmem:[%s3174_s11 + $0x198] sm:$0xff] }
 0x215   : > { %1185 = vadd.xlane.f32.xlu0 %v1184_v8  ;;  %v858_v8 = vld [vmem:[%s3171_s8 + $0x288] sm:$0xff]  ;;  %978 = vmatprep.subr.mxu1 %v864_v6  ;;  %v1427_v6 = vld [vmem:[%s3174_s11 + $0x180] sm:$0xff] }
 0x216   : > { %979 = vmatpush1.msra.mxu1 %v863_v7  ;;  %v1429_v7 = vld [vmem:[%s3174_s11 + $0x190] sm:$0xff] }
 0x217   : > { %1191 = vadd.xlane.f32.xlu1 %v1190_v9  ;;  %v857_v9 = vld [vmem:[%s3171_s8 + $0x280] sm:$0xff]  ;;  %980 = vmatprep.subr.mxu1 %v858_v8  ;;  %v1426_v8 = vld [vmem:[%s3174_s11 + $0x178] sm:$0xff] }
 0x218   : > { %981 = vmatpush1.msra.mxu1 %v857_v9  ;;  %v1423_v9 = vld [vmem:[%s3174_s11 + $0x160] sm:$0xff] }
 0x22b   : > { %1200 = vperm.xlu0 %2100, %v1971_v10   ;;  %v852_v10 = vld [vmem:[%s3171_s8 + $0x258] sm:$0xff] }
 0x22c   : > { %982 = vmatprep.subr.mxu1 %v852_v10  ;;  %v1425_v10 = vld [vmem:[%s3174_s11 + $0x170] sm:$0xff] }
 0x29a   : > { %v1183_v11 = vpop.xlane.xlu0 %1182 }
 0x29c   : > { %v1189_v13 = vpop.xlane.xlu1 %1188 }
 0x29e   : > { %v1186_v15 = vpop.xlane.xlu0 %1185 }
 0x2a0   : > { %v1192_v18 = vpop.xlane.xlu1 %1191 }
 0x2a6   : > { %v1201_v19 = vpop.permute.xlu0 %1200 }
 0x2a7   : > { %v1203_v20 = vadd.f32 %v1201_v19, %v1183_v11  ;;  %v1204_v21 = vadd.f32 %v1201_v19, %v1186_v15  ;;  %v1205_v22 = vadd.f32 %v1201_v19, %v1189_v13  ;;  %v1206_v23 = vadd.f32 %v1201_v19, %v1192_v18  ;;  %v851_v11 = vld [vmem:[%s3171_s8 + $0x250] sm:$0xff]  ;;  %v845_v13 = vld [vmem:[%s3171_s8 + $0x220] sm:$0xff]  ;;  %v834_v18 = vld [vmem:[%s3171_s8 + $0x1c8] sm:$0xff] }
 0x2a8   : > { %983 = vmatpush1.msra.mxu1 %v851_v11  ;;  %v839_v15 = vld [vmem:[%s3171_s8 + $0x1f0] sm:$0xff]  ;;  %v833_v19 = vld [vmem:[%s3171_s8 + $0x1c0] sm:$0xff] }
 0x2a9   : > { %v1216_v24 = vrot.slane %v1203_v20, %v2659_v16  ;;  %v1221_v25 = vrot.slane %v1204_v21, %v2662_v17  ;;  %v1227_v26 = vrot.slane %v1205_v22, %v2659_v16  ;;  %v1231_v27 = vrot.slane %v1206_v23, %v2662_v17  ;;  %984 = vmatprep.subr.mxu1 %v846_v12  ;;  %v1420_v12 = vld [vmem:[%s3174_s11 + $0x148] sm:$0xff] }
 0x2aa   : > { %985 = vmatpush1.msra.mxu1 %v845_v13  ;;  %v1422_v13 = vld [vmem:[%s3174_s11 + $0x158] sm:$0xff] }
 0x2ab   : > { %v1223_v28 = vsel %vm1222_vm3, %v1221_v25, %v1216_v24  ;;  %v1232_v29 = vsel %vm1222_vm3, %v1231_v27, %v1227_v26  ;;  %986 = vmatprep.subr.mxu1 %v840_v14  ;;  %v822_v24 = vld [vmem:[%s3171_s8 + $0x168] sm:$0xff]  ;;  %v821_v25 = vld [vmem:[%s3171_s8 + $0x160] sm:$0xff]  ;;  %v816_v26 = vld [vmem:[%s3171_s8 + $0x138] sm:$0xff] }
 0x2ac   : > { %v1234_v30 = vsel %vm1233_vm4, %v1232_v29, %v1223_v28  ;;  %987 = vmatpush1.msra.mxu1 %v839_v15  ;;  %v815_v27 = vld [vmem:[%s3171_s8 + $0x130] sm:$0xff]  ;;  %v810_v28 = vld [vmem:[%s3171_s8 + $0x108] sm:$0xff]  ;;  %v809_v29 = vld [vmem:[%s3171_s8 + $0x100] sm:$0xff] }
 0x2ad   : > { %v1237_v33 = vsel %vm1236_vm5, %v1234_v30, -inf  ;;  %988 = vmatprep.subr.mxu1 %v834_v18  ;;  %v804_v30 = vld [vmem:[%s3171_s8 + $0xd8] sm:$0xff]  ;;  %v1419_v14 = vld [vmem:[%s3174_s11 + $0x140] sm:$0xff]  ;;  %v1416_v15 = vld [vmem:[%s3174_s11 + $0x128] sm:$0xff] }
 0x2ae   : > { %1238 = vmax.xlane.f32.xlu1 %v1237_v33  ;;  %989 = vmatpush1.msra.mxu1 %v833_v19  ;;  %v803_v33 = vld [vmem:[%s3171_s8 + $0xd0] sm:$0xff]  ;;  %v1418_v18 = vld [vmem:[%s3174_s11 + $0x138] sm:$0xff]  ;;  %v1415_v19 = vld [vmem:[%s3174_s11 + $0x120] sm:$0xff] }
 0x337   : > { %v1239_v34 = vpop.xlane.xlu1 %1238 }
 0x338   : > { %v1244_v37 = vrot.slane %v1239_v34, %v2651_v46  ;;  %v1248_v40 = vrot.slane %v1239_v34, %v2673_v36  ;;  %v798_v34 = vld [vmem:[%s3171_s8 + $0xa8] sm:$0xff] }
 0x33a   : > { %v1251_v42 = vsub.f32 %v1203_v20, %v1244_v37  ;;  %v1252_v43 = vsub.f32 %v1204_v21, %v1244_v37  ;;  %v1253_v45 = vsub.f32 %v1205_v22, %v1248_v40  ;;  %v1254_v48 = vsub.f32 %v1206_v23, %v1248_v40  ;;  %v1442_v20 = vld [vmem:[%s3174_s11 + $0x1f8] sm:$0xff]  ;;  %v1441_v21 = vld [vmem:[%s3174_s11 + $0x1f0] sm:$0xff]  ;;  %v797_v37 = vld [vmem:[%s3171_s8 + $0xa0] sm:$0xff] }
 0x33b   : > { %v828_v22 = vld [vmem:[%s3171_s8 + $0x198] sm:$0xff]  ;;  %1514 = vmatprep.subr.mxu0 %v1442_v20  ;;  %v827_v23 = vld [vmem:[%s3171_s8 + $0x190] sm:$0xff] }
 0x33c   : > { %v1255_v44 = vmul.f32 1.442695, %v1251_v42  ;;  %v1257_v47 = vmul.f32 1.442695, %v1252_v43  ;;  %v1259_v49 = vmul.f32 1.442695, %v1253_v45  ;;  %1515 = vmatpush1.msra.mxu0 %v1441_v21  ;;  %990 = vmatprep.subr.mxu1 %v828_v22 }
 0x33d   : > { %v1261_v50 = vmul.f32 1.442695, %v1254_v48  ;;  %991 = vmatpush1.msra.mxu1 %v827_v23  ;;  %v792_v40 = vld [vmem:[%s3171_s8 + $0x78] sm:$0xff]  ;;  %v791_v42 = vld [vmem:[%s3171_s8 + $0x70] sm:$0xff]  ;;  %v786_v43 = vld [vmem:[%s3171_s8 + $0x48] sm:$0xff] }
 0x33e   : > { %2102 = vpow2.f32 %v1255_v44  ;;  %992 = vmatprep.subr.mxu1 %v822_v24  ;;  %v785_v44 = vld [vmem:[%s3171_s8 + $0x40] sm:$0xff]  ;;  %v780_v45 = vld [vmem:[%s3171_s8 + $0x18] sm:$0xff]  ;;  %v1440_v48 = vld [vmem:[%s3174_s11 + $0x1e8] sm:$0xff] }
 0x33f   : > { %2104 = vpow2.f32 %v1257_v47  ;;  %993 = vmatpush1.msra.mxu1 %v821_v25  ;;  %v779_v47 = vld [vmem:[%s3171_s8 + $0x10] sm:$0xff]  ;;  %v1412_v22 = vld [vmem:[%s3174_s11 + $0x108] sm:$0xff]  ;;  %v1414_v23 = vld [vmem:[%s3174_s11 + $0x118] sm:$0xff] }
 0x340   : > { %2106 = vpow2.f32 %v1259_v49  ;;  %994 = vmatprep.subr.mxu1 %v816_v26  ;;  %v1439_v49 = vld [vmem:[%s3174_s11 + $0x1e0] sm:$0xff]  ;;  %v1417_v20 = vld [vmem:[%s3174_s11 + $0x130] sm:$0xff]  ;;  %v1408_v25 = vld [vmem:[%s3174_s11 + $0xe8] sm:$0xff] }
 0x341   : > { %2108 = vpow2.f32 %v1261_v50  ;;  %995 = vmatpush1.msra.mxu1 %v815_v27  ;;  %v1411_v24 = vld [vmem:[%s3174_s11 + $0x100] sm:$0xff]  ;;  %v1410_v26 = vld [vmem:[%s3174_s11 + $0xf8] sm:$0xff] }
 0x342   : > { %996 = vmatprep.subr.mxu1 %v810_v28  ;;  %v1407_v27 = vld [vmem:[%s3174_s11 + $0xe0] sm:$0xff]  ;;  %v1409_v28 = vld [vmem:[%s3174_s11 + $0xf0] sm:$0xff] }
 0x343   : > { %997 = vmatpush1.msra.mxu1 %v809_v29  ;;  %v1404_v29 = vld [vmem:[%s3174_s11 + $0xc8] sm:$0xff] }
 0x344   : > { %998 = vmatprep.subr.mxu1 %v804_v30  ;;  %v1406_v30 = vld [vmem:[%s3174_s11 + $0xd8] sm:$0xff] }
 0x345   : > { %999 = vmatpush1.msra.mxu1 %v803_v33  ;;  %v1403_v33 = vld [vmem:[%s3174_s11 + $0xc0] sm:$0xff] }
 0x346   : > { %1000 = vmatprep.subr.mxu1 %v798_v34  ;;  %v1405_v34 = vld [vmem:[%s3174_s11 + $0xd0] sm:$0xff] }
 0x347   : > { %1001 = vmatpush1.msra.mxu1 %v797_v37  ;;  %v1400_v37 = vld [vmem:[%s3174_s11 + $0xa8] sm:$0xff] }
 0x348   : > { %1002 = vmatprep.subr.mxu1 %v792_v40  ;;  %v1402_v40 = vld [vmem:[%s3174_s11 + $0xb8] sm:$0xff] }
 0x349   : > { %1003 = vmatpush1.msra.mxu1 %v791_v42  ;;  %v1399_v42 = vld [vmem:[%s3174_s11 + $0xa0] sm:$0xff] }
 0x34a   : > { %1004 = vmatprep.subr.mxu1 %v786_v43  ;;  %v1401_v43 = vld [vmem:[%s3174_s11 + $0xb0] sm:$0xff] }
 0x34b   : > { %v2677_v51 = vpop.eup %2102  ;;  %1005 = vmatpush1.msra.mxu1 %v785_v44  ;;  %v1396_v44 = vld [vmem:[%s3174_s11 + $0x88] sm:$0xff] }
 0x34c   : > { %1268 = vperm.xlu1 %2101, %v2677_v51   ;;  %v2680_v52 = vpop.eup %2104  ;;  %1006 = vmatprep.subr.mxu1 %v780_v45  ;;  %v1398_v45 = vld [vmem:[%s3174_s11 + $0x98] sm:$0xff] }
 0x34d   : > { %v2683_v53 = vpop.eup %2106  ;;  %1007 = vmatpush1.msra.mxu1 %v779_v47  ;;  %v1395_v47 = vld [vmem:[%s3174_s11 + $0x80] sm:$0xff] }
 0x34e   : > { %v2686_v54 = vpop.eup %2108  ;;  %1443 = vmatprep.subr.mxu1 %v1440_v48  ;;  %1041 = vmatmul.mubr.f32.vlgmr.msra.gmra.mxu1 %v2532_v60  ;;  %v1435_v60 = vld [vmem:[%s3174_s11 + $0x1c0] sm:$0xff]  ;;  %v1397_v48 = vld [vmem:[%s3174_s11 + $0x90] sm:$0xff] }
 0x34f   : > { %1444 = vmatpush1.msra.mxu1 %v1439_v49  ;;  %1507 = vmatprep.mubr.f32.mxu1 %v2143_v31  ;;  %v1392_v49 = vld [vmem:[%s3174_s11 + $0x68] sm:$0xff] }
 0x350   : > { %1271 = vperm.xlu1 %2101, %v2680_v52  }
 0x354   : > { %1274 = vperm.xlu1 %2101, %v2683_v53  }
 0x358   : > { %1277 = vperm.xlu1 %2101, %v2686_v54  }
 0x3c7   : > { %v1269_v55 = vpop.permute.xlu1 %1268 }
 0x3c8   : > { %v1282_v61 = vrot.slane %v1269_v55, %v2659_v16 }
 0x3cb   : > { %v1272_v56 = vpop.permute.xlu1 %1271 }
 0x3cc   : > { %v1286_v58 = vrot.slane %v1272_v56, %v2662_v17 }
 0x3ce   : > { %v1287_v0 = vsel %vm1222_vm3, %v1286_v58, %v1282_v61  ;;  %v1438_v58 = vld [vmem:[%s3174_s11 + $0x1d8] sm:$0xff]  ;;  %v1437_v61 = vld [vmem:[%s3174_s11 + $0x1d0] sm:$0xff] }
 0x3cf   : > { %v1275_v57 = vpop.permute.xlu1 %1274  ;;  %1516 = vmatprep.subr.mxu0 %v1438_v58  ;;  %v1390_v58 = vld [vmem:[%s3174_s11 + $0x58] sm:$0xff] }
 0x3d0   : > { %v1291_v62 = vrot.slane %v1275_v57, %v2659_v16  ;;  %v1436_v57 = vld [vmem:[%s3174_s11 + $0x1c8] sm:$0xff]  ;;  %1517 = vmatpush1.msra.mxu0 %v1437_v61 }
 0x3d1   : > { %1445 = vmatprep.subr.mxu1 %v1436_v57  ;;  %v1388_v57 = vld [vmem:[%s3174_s11 + $0x48] sm:$0xff] }
 0x3d2   : > { %1446 = vmatpush1.msra.mxu1 %v1435_v60  ;;  %v1387_v60 = vld [vmem:[%s3174_s11 + $0x40] sm:$0xff]  ;;  %v1384_v61 = vld [vmem:[%s3174_s11 + $0x28] sm:$0xff] }
 0x3d3   : > { %v1278_v59 = vpop.permute.xlu1 %1277 }
 0x3d4   : > { %v1295_v63 = vrot.slane %v1278_v59, %v2662_v17 }
 0x3d6   : > { %v1296_v1 = vsel %vm1222_vm3, %v1295_v63, %v1291_v62  ;;  %v1432_v62 = vld [vmem:[%s3174_s11 + $0x1a8] sm:$0xff]  ;;  %v1434_v63 = vld [vmem:[%s3174_s11 + $0x1b8] sm:$0xff] }
 0x3d7   : > { %v1297_v2 = vsel %vm1233_vm4, %v1296_v1, %v1287_v0  ;;  %v1431_v1 = vld [vmem:[%s3174_s11 + $0x1a0] sm:$0xff]  ;;  %1447 = vmatprep.subr.mxu1 %v1432_v62  ;;  %1518 = vmatprep.subr.mxu0 %v1434_v63  ;;  %v1386_v62 = vld [vmem:[%s3174_s11 + $0x38] sm:$0xff] }
 0x3d8   : > { %v1299_v3 = vsel %vm1236_vm5, %v1297_v2, 0.0  ;;  %v1433_v2 = vld [vmem:[%s3174_s11 + $0x1b0] sm:$0xff]  ;;  %1448 = vmatpush1.msra.mxu1 %v1431_v1  ;;  %v1383_v63 = vld [vmem:[%s3174_s11 + $0x20] sm:$0xff]  ;;  %v1380_v1 = vld [vmem:[%s3174_s11 + $0x8] sm:$0xff] }
 0x3d9   : > { %1300 = vadd.xlane.f32.xlu1 %v1299_v3  ;;  %1519 = vmatpush1.msra.mxu0 %v1433_v2  ;;  %v1382_v2 = vld [vmem:[%s3174_s11 + $0x18] sm:$0xff] }
 0x3da   : > { %1520 = vmatprep.subr.mxu0 %v1430_v4  ;;  %v1378_v4 = vld [vmem:[%s3173_s10 + $0x78] sm:$0xff] }
 0x3db   : > { %1521 = vmatpush1.msra.mxu0 %v1429_v7 }
 0x3dc   : > { %1522 = vmatprep.subr.mxu0 %v1426_v8 }
 0x3dd   : > { %1523 = vmatpush1.msra.mxu0 %v1425_v10 }
 0x3de   : > { %1524 = vmatprep.subr.mxu0 %v1422_v13 }
 0x462   : > { %v1301_v50 = vpop.xlane.xlu1 %1300 }
 0x463   : > { %v1306_v55 = vrot.slane %v1301_v50, %v2651_v46  ;;  %v1310_v56 = vrot.slane %v1301_v50, %v2673_v36  ;;  %v1394_v50 = vld [vmem:[%s3174_s11 + $0x78] sm:$0xff] }
 0x465   : > { %2110 = vrcp.f32 %v1306_v55  ;;  %v1391_v55 = vld [vmem:[%s3174_s11 + $0x60] sm:$0xff] }
 0x466   : > { %2112 = vrcp.f32 %v1310_v56  ;;  %v1393_v56 = vld [vmem:[%s3174_s11 + $0x70] sm:$0xff] }
 0x472   : > { %v2111_v59 = vpop.eup %2110 }
 0x473   : > { %v1314_v0 = vmul.f32 %v2111_v59, %v2677_v51  ;;  %v1315_v3 = vmul.f32 %v2111_v59, %v2680_v52  ;;  %v1428_v51 = vld [vmem:[%s3174_s11 + $0x188] sm:$0xff]  ;;  %v2113_v5 = vpop.eup %2112  ;;  %v1389_v59 = vld [vmem:[%s3174_s11 + $0x50] sm:$0xff] }
 0x474   : > { %1449 = vmatprep.subr.mxu1 %v1428_v51  ;;  %v1424_v52 = vld [vmem:[%s3174_s11 + $0x168] sm:$0xff]  ;;  %v1317_v11 = vmul.f32 %v2113_v5, %v2683_v53  ;;  %v1421_v53 = vld [vmem:[%s3174_s11 + $0x150] sm:$0xff]  ;;  %v1318_v21 = vmul.f32 %v2113_v5, %v2686_v54 }
 0x475   : > { %1321 = vperm.xlu0 %2100, %v1314_v0   ;;  %1450 = vmatpush1.msra.mxu1 %v1427_v6  ;;  %v1413_v54 = vld [vmem:[%s3174_s11 + $0x110] sm:$0xff]  ;;  %v1376_v5 = vld [vmem:[%s3173_s10 + $0x68] sm:$0xff]  ;;  %v893_v6 = vsub.s32 4, %v2634_v32 }
 0x476   : > { %1451 = vmatprep.subr.mxu1 %v1424_v52  ;;  %1525 = vmatpush1.msra.mxu0 %v1421_v53  ;;  %v1385_v0 = vld [vmem:[%s3174_s11 + $0x30] sm:$0xff] }
 0x477   : > { %1452 = vmatpush1.msra.mxu1 %v1423_v9  ;;  %1526 = vmatprep.subr.mxu0 %v1418_v18  ;;  %v1381_v51 = vld [vmem:[%s3174_s11 + $0x10] sm:$0xff]  ;;  %v894_v7 = vrot.slane %v2642_v38, %v893_v6  ;;  %v1362_v6 = vld [vmem:[%s494_s25] sm:$0x3] }
 0x478   : > { %1453 = vmatprep.subr.mxu1 %v1420_v12  ;;  %1527 = vmatpush1.msra.mxu0 %v1417_v20  ;;  %v774_v12 = vld [vmem:[%s3163_s0 + $0x8] sm:$0xff] }
 0x479   : > { %1326 = vperm.xlu0 %2100, %v1315_v3   ;;  %1454 = vmatpush1.msra.mxu1 %v1419_v14  ;;  %v1379_v3 = vld [vmem:[%s3174_s11] sm:$0xff]  ;;  %v1114_v52 = vadd.f32 %v2647_v41, %v894_v7  ;;  %v775_v41 = vld [vmem:[%s3163_s0 + $0x10] sm:$0xff]  ;;  %v1776_v7 = vld [vmem:[%s3175_s12 + $0x78] sm:$0xff] }
 0x47a   : > { %1455 = vmatprep.subr.mxu1 %v1416_v15  ;;  %1528 = vmatprep.subr.mxu0 %v1414_v23 }
 0x47b   : > { %1456 = vmatpush1.msra.mxu1 %v1415_v19  ;;  %1529 = vmatpush1.msra.mxu0 %v1413_v54  ;;  %v1118_v8 = vsub.f32 0.0, %v1114_v52  ;;  %v1775_v52 = vld [vmem:[%s3175_s12 + $0x70] sm:$0xff] }
 0x47c   : > { %1457 = vmatprep.subr.mxu1 %v1412_v22  ;;  %1530 = vmatprep.subr.mxu0 %v1410_v26 }
 0x47d   : > { %1331 = vperm.xlu0 %2100, %v1317_v11   ;;  %1458 = vmatpush1.msra.mxu1 %v1411_v24  ;;  %v1119_v9 = vmul.f32 1.442695, %v1118_v8  ;;  %v773_v11 = vld [vmem:[%s3163_s0] sm:$0xff]  ;;  %v1774_v8 = vld [vmem:[%s3175_s12 + $0x68] sm:$0xff] }
 0x47e   : > { %1459 = vmatprep.subr.mxu1 %v1408_v25  ;;  %1531 = vmatpush1.msra.mxu0 %v1409_v28 }
 0x47f   : > { %1460 = vmatpush1.msra.mxu1 %v1407_v27  ;;  %1532 = vmatprep.subr.mxu0 %v1406_v30  ;;  %2114 = vpow2.f32 %v1119_v9  ;;  %v1773_v9 = vld [vmem:[%s3175_s12 + $0x60] sm:$0xff] }
 0x480   : > { %1461 = vmatprep.subr.mxu1 %v1404_v29  ;;  %1533 = vmatpush1.msra.mxu0 %v1405_v34 }
 0x481   : > { %1336 = vperm.xlu0 %2100, %v1318_v21   ;;  %1462 = vmatpush1.msra.mxu1 %v1403_v33  ;;  %v776_v21 = vld [vmem:[%s3163_s0 + $0x18] sm:$0xff] }
 0x482   : > { %1463 = vmatprep.subr.mxu1 %v1400_v37  ;;  %1534 = vmatprep.subr.mxu0 %v1402_v40 }
 0x483   : > { %1464 = vmatpush1.msra.mxu1 %v1399_v42  ;;  %1535 = vmatpush1.msra.mxu0 %v1401_v43 }
 0x484   : > { %1465 = vmatprep.subr.mxu1 %v1396_v44  ;;  %1536 = vmatprep.subr.mxu0 %v1398_v45 }
 0x485   : > { %1466 = vmatpush1.msra.mxu1 %v1395_v47  ;;  %1537 = vmatpush1.msra.mxu0 %v1397_v48 }
 0x486   : > { %1467 = vmatprep.subr.mxu1 %v1392_v49  ;;  %1538 = vmatprep.subr.mxu0 %v1394_v50 }
 0x487   : > { %1468 = vmatpush1.msra.mxu1 %v1391_v55  ;;  %1539 = vmatpush1.msra.mxu0 %v1393_v56 }
 0x488   : > { %1469 = vmatprep.subr.mxu1 %v1388_v57  ;;  %1540 = vmatprep.subr.mxu0 %v1390_v58  ;;  %v1375_v57 = vld [vmem:[%s3173_s10 + $0x60] sm:$0xff]  ;;  %v1377_v58 = vld [vmem:[%s3173_s10 + $0x70] sm:$0xff] }
 0x489   : > { %1470 = vmatpush1.msra.mxu1 %v1387_v60  ;;  %1541 = vmatpush1.msra.mxu0 %v1389_v59  ;;  %v1372_v60 = vld [vmem:[%s3173_s10 + $0x48] sm:$0xff]  ;;  %v1374_v59 = vld [vmem:[%s3173_s10 + $0x58] sm:$0xff] }
 0x48a   : > { %1471 = vmatprep.subr.mxu1 %v1384_v61  ;;  %1542 = vmatprep.subr.mxu0 %v1386_v62  ;;  %v1371_v61 = vld [vmem:[%s3173_s10 + $0x40] sm:$0xff]  ;;  %v1373_v62 = vld [vmem:[%s3173_s10 + $0x50] sm:$0xff] }
 0x48b   : > { %1472 = vmatpush1.msra.mxu1 %v1383_v63  ;;  %1543 = vmatpush1.msra.mxu0 %v1385_v0  ;;  %v1368_v63 = vld [vmem:[%s3173_s10 + $0x28] sm:$0xff]  ;;  %v1370_v0 = vld [vmem:[%s3173_s10 + $0x38] sm:$0xff] }
 0x48c   : > { %1473 = vmatprep.subr.mxu1 %v1380_v1  ;;  %1544 = vmatprep.subr.mxu0 %v1382_v2  ;;  %v2115_v19 = vpop.eup %2114  ;;  %v1367_v1 = vld [vmem:[%s3173_s10 + $0x20] sm:$0xff]  ;;  %v1369_v2 = vld [vmem:[%s3173_s10 + $0x30] sm:$0xff] }
 0x48d   : > { %1474 = vmatpush1.msra.mxu1 %v1379_v3  ;;  %1545 = vmatpush1.msra.mxu0 %v1381_v51  ;;  %v1121_v24 = vadd.f32 1.0, %v2115_v19  ;;  %v1364_v3 = vld [vmem:[%s3173_s10 + $0x8] sm:$0xff]  ;;  %v1366_v51 = vld [vmem:[%s3173_s10 + $0x18] sm:$0xff] }
 0x48e   : > { %1684 = vmatprep.subr.mxu1 %v1378_v4  ;;  %1613 = vmatprep.subr.mxu0 %v1376_v5  ;;  %v1363_v4 = vld [vmem:[%s3173_s10] sm:$0xff]  ;;  %v1365_v5 = vld [vmem:[%s3173_s10 + $0x10] sm:$0xff]  ;;  %v1764_v19 = vld [vmem:[%s3175_s12 + $0x18] sm:$0xff] }
 0x48f   : > { %2116 = vrcp.f32 %v1121_v24 }
 0x49c   : > { %v2117_v50 = vpop.eup %2116 }
 0x4f0   : > { %v1322_v10 = vpop.permute.xlu0 %1321 }
 0x4f1   : > { %v1339_v14 = vmul.f32 %v1322_v10, %v773_v11  ;;  %v1858_v54 = vrot.slane %v1322_v10, %v2659_v16  ;;  %v1772_v10 = vld [vmem:[%s3175_s12 + $0x58] sm:$0xff]  ;;  %v1771_v11 = vld [vmem:[%s3175_s12 + $0x50] sm:$0xff] }
 0x4f4   : > { %v1327_v13 = vpop.permute.xlu0 %1326 }
 0x4f5   : > { %v1340_v53 = vmul.f32 %v1327_v13, %v774_v12  ;;  %v1862_v23 = vrot.slane %v1327_v13, %v2662_v17  ;;  %v1770_v12 = vld [vmem:[%s3175_s12 + $0x48] sm:$0xff]  ;;  %v1769_v13 = vld [vmem:[%s3175_s12 + $0x40] sm:$0xff] }
 0x4f7   : > { %v1343_v15 = vadd.f32 %v1340_v53, %v1339_v14  ;;  %v1863_v33 = vsel %vm1222_vm3, %v1862_v23, %v1858_v54  ;;  %v1768_v14 = vld [vmem:[%s3175_s12 + $0x38] sm:$0xff]  ;;  %v1767_v53 = vld [vmem:[%s3175_s12 + $0x30] sm:$0xff] }
 0x4f8   : > { %v1332_v18 = vpop.permute.xlu0 %1331 }
 0x4f9   : > { %v1344_v20 = vrot.slane %v1343_v15, 4  ;;  %v1341_v26 = vmul.f32 %v1332_v18, %v775_v41  ;;  %v1867_v27 = vrot.slane %v1332_v18, %v2659_v16  ;;  %v1765_v18 = vld [vmem:[%s3175_s12 + $0x20] sm:$0xff]  ;;  %v1762_v41 = vld [vmem:[%s3175_s12 + $0x8] sm:$0xff] }
 0x4fb   : > { %v1345_v22 = vadd.f32 %v1344_v20, %v1343_v15  ;;  %v1766_v15 = vld [vmem:[%s3175_s12 + $0x28] sm:$0xff]  ;;  %v1763_v20 = vld [vmem:[%s3175_s12 + $0x10] sm:$0xff] }
 0x4fc   : > { %v1337_v25 = vpop.permute.xlu0 %1336 }
 0x4fd   : > { %v1342_v28 = vmul.f32 %v1337_v25, %v776_v21  ;;  %v1871_v29 = vrot.slane %v1337_v25, %v2662_v17  ;;  %v1346_v30 = vrot.slane %v1345_v22, 2  ;;  %v1761_v21 = vld [vmem:[%s3175_s12] sm:$0xff]  ;;  %v878_v25 = vrot.slane %v2642_v38, %v2651_v46 }
 0x4ff   : > { %v1350_v34 = vadd.f32 %v1342_v28, %v1341_v26  ;;  %v1872_v37 = vsel %vm1222_vm3, %v1871_v29, %v1867_v27  ;;  %v1347_v16 = vadd.f32 %v1346_v30, %v1345_v22  ;;  %v1042_v22 = vpop.f32.mrf.mxu1  ;;  %v882_v27 = vrot.slane %v2642_v38, %v2673_v36 }
 0x500   : > { %v1873_v40 = vsel %vm1233_vm4, %v1872_v37, %v1863_v33  ;;  %v972_v30 = vadd.f32 %v2636_v35, %v878_v25 }
 0x501   : > { %v1351_v42 = vrot.slane %v1350_v34, 4  ;;  %1875 = vst.msk [vmem:[%s502_s16] sm:$0x3] %vm1236_vm5, %v1873_v40  ;;  %v1348_v17 = vrot.slane %v1347_v16, 1  ;;  %v1044_v23 = vpop.f32.mrf.mxu1  ;;  %v974_v40 = vadd.f32 %v2644_v39, %v882_v27 }
 0x503   : > { %v1352_v43 = vadd.f32 %v1351_v42, %v1350_v34  ;;  %v1349_v48 = vadd.f32 %v1348_v17, %v1347_v16 }
 0x505   : > { %v1353_v44 = vrot.slane %v1352_v43, 2 }
 0x507   : > { %v1354_v45 = vadd.f32 %v1353_v44, %v1352_v43 }
 0x509   : > { %v1355_v47 = vrot.slane %v1354_v45, 1 }
 0x50b   : > { %v1356_v49 = vadd.f32 %v1355_v47, %v1354_v45 }
 0x50d   : > { %v1359_v55 = vsel %vm1233_vm4, %v1356_v49, %v1349_v48  ;;  %v885_v49 = vsub.s32 2, %v2634_v32 }
 0x50e   : > { %v1361_v56 = vmul.f32 %v2117_v50, %v1359_v55 }
 0x50f   : > { %v886_v55 = vrot.slane %v2642_v38, %v885_v49 }
 0x510   : > { %1508 = vmatmul.mubr.f32.vlgmr.msra.gmra.mxu1 %v1361_v56  ;;  %1579 = vmatmul.mubr.f32.vlgmr.msra.gmra.mxu0 %v1361_v56 }
 0x511   : > { %1614 = vmatpush1.msra.mxu0 %v1375_v57  ;;  %1685 = vmatpush1.msra.mxu1 %v1377_v58  ;;  %v1043_v57 = vadd.f32 %v1042_v22, %v886_v55 }
 0x512   : > { %1615 = vmatprep.subr.mxu0 %v1372_v60  ;;  %1686 = vmatprep.subr.mxu1 %v1374_v59 }
 0x513   : > { %1616 = vmatpush1.msra.mxu0 %v1371_v61  ;;  %1687 = vmatpush1.msra.mxu1 %v1373_v62 }
 0x514   : > { %1617 = vmatprep.subr.mxu0 %v1368_v63  ;;  %1688 = vmatprep.subr.mxu1 %v1370_v0 }
 0x515   : > { %1618 = vmatpush1.msra.mxu0 %v1367_v1  ;;  %1689 = vmatpush1.msra.mxu1 %v1369_v2  ;;  %v772_v2 = vld [vmem:[#allocation4] sm:$0x3] }
 0x516   : > { %1619 = vmatprep.subr.mxu0 %v1364_v3  ;;  %1690 = vmatprep.subr.mxu1 %v1366_v51 }
 0x517   : > { %1620 = vmatpush1.msra.mxu0 %v1363_v4  ;;  %1653 = vmatprep.mubr.f32.mxu0 %v2143_v31 }
 0x518   : > { %1691 = vmatpush1.msra.mxu1 %v1365_v5  ;;  %1724 = vmatprep.mubr.f32.mxu1 %v2143_v31 }
 0x519   : > { %1972 = vmatmul.mubr.msk.f32.vlgmr.msra.gmra.mxu0 %vm1585_vm6, %v1362_v6  ;;  %1973 = vmatmul.mubr.msk.f32.vlgmr.msra.gmra.mxu1 %vm1585_vm6, %v1362_v6 }
 0x51a   : > { %2052 = vmatprep.subr.mxu1 %v2143_v31  ;;  %2084 = vmatprep.mubr.msk.f32.mxu1 %vm2146_vm7, %v2143_v31 }
 0x51b   : > { %2053 = vmatpush3.msra.mxu1 %v1776_v7 }
 0x51c   : > { %2054 = vmatprep.subr.mxu1 %v2143_v31 }
 0x51d   : > { %2055 = vmatpush3.msra.mxu1 %v1775_v52 }
 0x51e   : > { %2056 = vmatprep.subr.mxu1 %v2143_v31 }
 0x51f   : > { %2057 = vmatpush3.msra.mxu1 %v1774_v8  ;;  %v1974_v8 = vld [vmem:[%s3176_s13] ss:$0 sm:$0xff] }
 0x520   : > { %2058 = vmatprep.subr.mxu1 %v2143_v31 }
 0x521   : > { %2059 = vmatpush3.msra.mxu1 %v1773_v9 }
 0x522   : > { %2060 = vmatprep.subr.mxu1 %v2143_v31 }
 0x523   : > { %2061 = vmatpush3.msra.mxu1 %v1772_v10 }
 0x524   : > { %2062 = vmatprep.subr.mxu1 %v2143_v31 }
 0x525   : > { %2063 = vmatpush3.msra.mxu1 %v1771_v11 }
 0x526   : > { %2064 = vmatprep.subr.mxu1 %v2143_v31 }
 0x527   : > { %2065 = vmatpush3.msra.mxu1 %v1770_v12 }
 0x528   : > { %2066 = vmatprep.subr.mxu1 %v2143_v31 }
 0x529   : > { %2067 = vmatpush3.msra.mxu1 %v1769_v13 }
 0x52a   : > { %2068 = vmatprep.subr.mxu1 %v2143_v31 }
 0x52b   : > { %2069 = vmatpush3.msra.mxu1 %v1768_v14 }
 0x52c   : > { %2070 = vmatprep.subr.mxu1 %v2143_v31 }
 0x52d   : > { %2071 = vmatpush3.msra.mxu1 %v1767_v53 }
 0x52e   : > { %2072 = vmatprep.subr.mxu1 %v2143_v31 }
 0x52f   : > { %2073 = vmatpush3.msra.mxu1 %v1766_v15 }
 0x530   : > { %2074 = vmatprep.subr.mxu1 %v2143_v31 }
 0x531   : > { %2075 = vmatpush3.msra.mxu1 %v1765_v18 }
 0x532   : > { %2076 = vmatprep.subr.mxu1 %v2143_v31 }
 0x533   : > { %2077 = vmatpush3.msra.mxu1 %v1764_v19 }
 0x534   : > { %2078 = vmatprep.subr.mxu1 %v2143_v31 }
 0x535   : > { %2079 = vmatpush3.msra.mxu1 %v1763_v20 }
 0x536   : > { %2080 = vmatprep.subr.mxu1 %v2143_v31 }
 0x537   : > { %2081 = vmatpush3.msra.mxu1 %v1762_v41 }
 0x538   : > { %2082 = vmatprep.subr.mxu1 %v2143_v31  ;;  %v889_v31 = vsub.s32 3, %v2634_v32 }
 0x539   : > { %2083 = vmatpush3.msra.mxu1 %v1761_v21 }
 0x53a   : > { %v890_v17 = vrot.slane %v2642_v38, %v889_v31 }
 0x53c   : > { %v1045_v35 = vadd.f32 %v1044_v23, %v890_v17 }
 0x5d0   : > { %v1580_v24 = vpop.f32.mrf.mxu0  ;;  %v1509_v54 = vpop.f32.mrf.mxu1 }
 0x5d2   : > { %v1582_v26 = vpop.f32.mrf.mxu0  ;;  %v1511_v28 = vpop.f32.mrf.mxu1 }
 0x5d9   : > { %v1655_v29 = vpop.f32.mrf.mxu0  ;;  %v1726_v34 = vpop.f32.mrf.mxu1 }
 0x5da   : > { %v1656_v33 = vadd.f32 %v1655_v29, %v1509_v54  ;;  %v1727_v56 = vadd.f32 %v1726_v34, %v1580_v24 }
 0x5db   : > { %v1657_v37 = vpop.f32.mrf.mxu0  ;;  %v1728_v46 = vpop.f32.mrf.mxu1 }
 0x5dc   : > { %v1731_v42 = vadd.f32 %v1656_v33, %v972_v30  ;;  %v1658_v16 = vadd.f32 %v1657_v37, %v1511_v28  ;;  %v1729_v47 = vadd.f32 %v1728_v46, %v1582_v26  ;;  %v1733_v59 = vadd.f32 %v1727_v56, %v1043_v57 }
 0x5de   : > { %v1735_v43 = vsub.f32 0.0, %v1731_v42  ;;  %v1732_v44 = vadd.f32 %v1658_v16, %v974_v40  ;;  %v1734_v50 = vadd.f32 %v1729_v47, %v1045_v35 }
 0x5e0   : > { %v1736_v45 = vmul.f32 1.442695, %v1735_v43  ;;  %v1741_v36 = vsub.f32 0.0, %v1732_v44  ;;  %v1748_v39 = vsub.f32 0.0, %v1734_v50 }
 0x5e2   : > { %2118 = vpow2.f32 %v1736_v45  ;;  %v1742_v48 = vmul.f32 1.442695, %v1741_v36  ;;  %v1749_v58 = vmul.f32 1.442695, %v1748_v39 }
 0x5e4   : > { %2120 = vpow2.f32 %v1742_v48 }
 0x5e5   : > { %2122 = vpow2.f32 %v1749_v58 }
 0x5ef   : > { %v2119_v60 = vpop.eup %2118 }
 0x5f0   : > { %v1738_v61 = vadd.f32 1.0, %v2119_v60 }
 0x5f1   : > { %v2121_v62 = vpop.eup %2120 }
 0x5f2   : > { %2124 = vrcp.f32 %v1738_v61  ;;  %v1744_v63 = vadd.f32 1.0, %v2121_v62  ;;  %v2123_v0 = vpop.eup %2122 }
 0x5f3   : > { %2126 = vtanh.f32 %v1733_v59  ;;  %v1751_v51 = vadd.f32 1.0, %v2123_v0 }
 0x5f4   : > { %2128 = vrcp.f32 %v1744_v63 }
 0x5f5   : > { %2130 = vrcp.f32 %v1751_v51 }
 0x5ff   : > { %v2125_v1 = vpop.eup %2124 }
 0x600   : > { %v2127_v32 = vpop.eup %2126 }
 0x601   : > { %v2129_v3 = vpop.eup %2128  ;;  %v1755_v38 = vmul.f32 %v2127_v32, %v2125_v1 }
 0x602   : > { %v1754_v4 = vmul.f32 %v2129_v3, %v772_v2  ;;  %v2131_v6 = vpop.eup %2130 }
 0x604   : > { %v1756_v5 = vadd.f32 %v1755_v38, %v1754_v4 }
 0x606   : > { %2132 = vtanh.f32 %v1756_v5  ;;  %1760 = vst [vmem:[#allocation4] sm:$0x3] %v1756_v5 }
 0x613   : > { %v2133_v7 = vpop.eup %2132 }
 0x614   : > { %v1758_v52 = vmul.f32 %v2133_v7, %v2131_v6 }
 0x616   : > { %1759 = vst [vmem:[#allocation3] sm:$0x3] %v1758_v52  ;;  %2085 = vmatmul.mubr.f32.vlgmr.msra.gmra.mxu1 %v1758_v52 }
 0x6d6   : > { %v1850_v9 = vpop.f32.mrf.mxu1 }
 0x6d7   : > { %v1851_v10 = vadd.f32 %v1974_v8, %v1850_v9 }
 0x6d8   : > { %v2086_v11 = vpop.f32.mrf.mxu1 }
 0x6d9   : > { %1854 = vst [vmem:[%s498_s28] sm:$0x3] %v1851_v10 }
 0x6da PF: > { %s28_s20 = sadd.s32 1, %s2140_s20  }
 0x6db   : > { %p25_p5 = scmp.ge.s32.totalorder %s28_s20, 10  }
 0x6dd   :  { %27 = sbr.rel (!%p25_p5) target bundleno = 3 (0x3), region = 122 }

</bundles_post_ra>
